<compile_context>
chip_gen: v7x
topology: tpu7x:2x2x1
jax: 0.10.0
libtpu: 0.0.40
codegen_flags: <defaults>
</compile_context>

<pallas_src>
import functools

import jax
import jax.numpy as jnp
from jax import lax
from jax.experimental import pallas as pl
from jax.experimental.pallas import tpu as pltpu


def _round_up(x, m):
    return ((x + m - 1) // m) * m


def _conv_out_dim(h, k, s):
    return (h - k) // s + 1


def _m_tiling(M, block_m):
    # bf16 packs 2 rows per sublane -> keep M tiles multiples of 16.
    if M >= block_m:
        tm = block_m
    else:
        tm = max(_round_up(M, 16), 16)
    return tm, _round_up(M, tm)


# ----------------------------------------------------------------------------
# Kernel 1: conv1 + conv2 fused (one grid step per image, VMEM-resident)
# ----------------------------------------------------------------------------
def _conv12_kernel(p_ref, w1_ref, b1_ref, w2_ref, b2_ref, o_ref, *,
                   n_k, n_pix, blk):
    # conv1: one GEMM over all (n_k * blk) expanded patch rows + bias + ReLU.
    h1 = jnp.dot(p_ref[0], w1_ref[...], preferred_element_type=jnp.float32)
    h1 = jnp.maximum(h1 + b1_ref[...], 0.0).astype(jnp.bfloat16)   # (n_k*blk, 32)

    # conv2: sum over the 16 (ki, kj) filter taps.  Patch rows were
    # pre-gathered into conv2-window order, so each tap is a 16-row-aligned
    # slice of h1 times a (32, 64) weight -- no reshapes or strided gathers.
    acc = jnp.zeros((blk, w2_ref.shape[2]), jnp.float32)
    for k in range(n_k):
        acc = acc + jnp.dot(h1[k * blk:(k + 1) * blk, :], w2_ref[k],
                            preferred_element_type=jnp.float32)
    out2 = jnp.maximum(acc[:n_pix, :] + b2_ref[...], 0.0)
    o_ref[0] = out2.astype(o_ref.dtype)


def conv12(p1e, kp, *, n_k, n_pix, blk):
    N, rows, k1 = p1e.shape
    assert rows == n_k * blk
    oc1 = kp["c1_w"].shape[1]
    oc2 = kp["c2_w"].shape[2]
    return pl.pallas_call(
        functools.partial(_conv12_kernel, n_k=n_k, n_pix=n_pix, blk=blk),
        out_shape=jax.ShapeDtypeStruct((N, n_pix, oc2), jnp.bfloat16),
        grid_spec=pltpu.PrefetchScalarGridSpec(
            num_scalar_prefetch=0,
            grid=(N,),
            in_specs=[
                pl.BlockSpec((1, rows, k1), lambda b: (b, 0, 0)),
                pl.BlockSpec((k1, oc1), lambda b: (0, 0)),
                pl.BlockSpec((1, oc1), lambda b: (0, 0)),
                pl.BlockSpec((n_k, oc1, oc2), lambda b: (0, 0, 0)),
                pl.BlockSpec((1, oc2), lambda b: (0, 0)),
            ],
            out_specs=pl.BlockSpec((1, n_pix, oc2), lambda b: (b, 0, 0)),
        ),
        compiler_params=pltpu.CompilerParams(
            dimension_semantics=("parallel",),
            vmem_limit_bytes=32 * 1024 * 1024),
    )(p1e, kp["c1_w"], kp["c1_b"], kp["c2_w"], kp["c2_b"])


# ----------------------------------------------------------------------------
# Kernel 2: conv3 + fc1 + fc2 + fc3 (both dueling heads) + dueling combine
# ----------------------------------------------------------------------------
def _head_kernel(x_ref, wc3_ref, bc3_ref, w1_ref, b1_ref, w2_ref, b2_ref,
                 w3_ref, b3_ref, o_ref, *, num_actions):
    # conv3 (1x1 output => pure GEMM on the flattened conv2 map)
    h0 = jnp.dot(x_ref[...], wc3_ref[...], preferred_element_type=jnp.float32)
    h0 = jnp.maximum(h0 + bc3_ref[...], 0.0)
    # fc1: [advantage 512 | value 512] concatenated -> 1024 wide
    h1 = jnp.dot(h0.astype(jnp.bfloat16), w1_ref[...],
                 preferred_element_type=jnp.float32)
    h1 = jnp.maximum(h1 + b1_ref[...], 0.0)
    # fc2: block-diagonal (1024, 128) -> [adv 64 | val 64]
    h2 = jnp.dot(h1.astype(jnp.bfloat16), w2_ref[...],
                 preferred_element_type=jnp.float32)
    h2 = jnp.maximum(h2 + b2_ref[...], 0.0)
    # fc3: block-diagonal, 128-lane padded -> cols [0:A]=adv, [A]=val, rest 0
    h3 = jnp.dot(h2.astype(jnp.bfloat16), w3_ref[...],
                 preferred_element_type=jnp.float32)
    h3 = h3 + b3_ref[...]

    col = lax.broadcasted_iota(jnp.int32, h3.shape, 1)
    adv_mask = col < num_actions
    adv_mean = jnp.sum(jnp.where(adv_mask, h3, 0.0), axis=1,
                       keepdims=True) * (1.0 / num_actions)
    val = jnp.sum(jnp.where(col == num_actions, h3, 0.0), axis=1,
                  keepdims=True)
    # Q = value + advantage - advantage.mean(1, keepdim=True); zero padded lanes
    q = val + h3 - adv_mean
    o_ref[...] = jnp.where(adv_mask, q, 0.0)


def fused_head(flat, kp, *, num_actions, block_m=256):
    M, K = flat.shape
    tm, Mp = _m_tiling(M, block_m)
    xb = flat
    if Mp != M:
        xb = jnp.pad(xb, ((0, Mp - M), (0, 0)))   # single pad in the whole fwd

    out = pl.pallas_call(
        functools.partial(_head_kernel, num_actions=num_actions),
        out_shape=jax.ShapeDtypeStruct((Mp, 128), jnp.float32),
        grid_spec=pltpu.PrefetchScalarGridSpec(
            num_scalar_prefetch=0,
            grid=(Mp // tm,),
            in_specs=[
                pl.BlockSpec((tm, K), lambda i: (i, 0)),
                pl.BlockSpec((K, 64), lambda i: (0, 0)),
                pl.BlockSpec((1, 64), lambda i: (0, 0)),
                pl.BlockSpec((64, 1024), lambda i: (0, 0)),
                pl.BlockSpec((1, 1024), lambda i: (0, 0)),
                pl.BlockSpec((1024, 128), lambda i: (0, 0)),
                pl.BlockSpec((1, 128), lambda i: (0, 0)),
                pl.BlockSpec((128, 128), lambda i: (0, 0)),
                pl.BlockSpec((1, 128), lambda i: (0, 0)),
            ],
            out_specs=pl.BlockSpec((tm, 128), lambda i: (i, 0)),
        ),
        compiler_params=pltpu.CompilerParams(
            dimension_semantics=("parallel",),
            vmem_limit_bytes=32 * 1024 * 1024),
    )(xb, kp["c3_w"], kp["c3_b"], kp["h1_w"], kp["h1_b"],
      kp["h2_w"], kp["h2_b"], kp["h3_w"], kp["h3_b"])
    return out[:M, :num_actions]


# ----------------------------------------------------------------------------
# Parameter init (torch-layout, synthetic) + kernel-layout preparation
# ----------------------------------------------------------------------------
def init_dqn_params(key, input_shape, num_actions):
    """Same shapes as the torch module; Linear weights stored as (in, out)."""
    C, H, W = input_shape
    h1, w1 = _conv_out_dim(H, 8, 4), _conv_out_dim(W, 8, 4)
    h2, w2 = _conv_out_dim(h1, 4, 2), _conv_out_dim(w1, 4, 2)
    h3, w3 = _conv_out_dim(h2, 3, 1), _conv_out_dim(w2, 3, 1)
    conv_out = 64 * h3 * w3

    keys = jax.random.split(key, 18)

    def u(k, shape, fan_in):
        bound = 1.0 / jnp.sqrt(jnp.float32(fan_in))
        return jax.random.uniform(k, shape, jnp.float32, -bound, bound)

    return {
        "c1_w": u(keys[0], (32, C, 8, 8), C * 64),   "c1_b": u(keys[1], (32,), C * 64),
        "c2_w": u(keys[2], (64, 32, 4, 4), 32 * 16), "c2_b": u(keys[3], (64,), 32 * 16),
        "c3_w": u(keys[4], (64, 64, 3, 3), 64 * 9),  "c3_b": u(keys[5], (64,), 64 * 9),
        "a1_w": u(keys[6], (conv_out, 512), conv_out), "a1_b": u(keys[7], (512,), conv_out),
        "a2_w": u(keys[8], (512, 64), 512),            "a2_b": u(keys[9], (64,), 512),
        "a3_w": u(keys[10], (64, num_actions), 64),    "a3_b": u(keys[11], (num_actions,), 64),
        "v1_w": u(keys[12], (conv_out, 512), conv_out), "v1_b": u(keys[13], (512,), conv_out),
        "v2_w": u(keys[14], (512, 64), 512),            "v2_b": u(keys[15], (64,), 512),
        "v3_w": u(keys[16], (64, 1), 64),               "v3_b": u(keys[17], (1,), 64),
    }


def prepare_kernel_params(p, input_shape, num_actions):
    """One-time (outside jit) conversion from torch layout to kernel layout."""
    C, H, W = input_shape
    h1o, w1o = _conv_out_dim(H, 8, 4), _conv_out_dim(W, 8, 4)
    h2o, w2o = _conv_out_dim(h1o, 4, 2), _conv_out_dim(w1o, 4, 2)
    h3o, w3o = _conv_out_dim(h2o, 3, 1), _conv_out_dim(w2o, 3, 1)
    A = num_actions
    # Fused head assumes conv3's 3x3 window covers the whole conv2 map
    # (true for 36x36 inputs).
    # TODO(synk): generalize to 84x84 (conv_out 3136): keep conv3 spatial and
    #             permute fc1 rows to the NHWC flatten order instead.
    assert h3o == 1 and w3o == 1, "fused head assumes a 1x1 conv3 output"
    assert A + 1 <= 128, "num_actions must fit in the 128-lane head output"

    n_pix = h2o * w2o            # conv2 output pixels (= 9)
    blk = 16                     # rows reserved per (ki,kj) tap (16-row aligned)
    n_k = 4 * 4                  # conv2 filter taps

    # Row gather for the expanded conv1-patch matrix: for tap (ki,kj), the
    # conv1-output pixels feeding every conv2 window, padded to `blk` rows.
    idx = []
    for ki in range(4):
        for kj in range(4):
            rows = [(2 * pp + ki) * w1o + (2 * qq + kj)
                    for pp in range(h2o) for qq in range(w2o)]
            assert len(rows) <= blk
            rows += [rows[-1]] * (blk - len(rows))
            idx.extend(rows)
    row_idx = jnp.asarray(idx, dtype=jnp.int32)

    # conv1 GEMM weight: rows in (C, kh, kw) order == conv_general_dilated_patches
    c1_w = p["c1_w"].reshape(32, -1).T.astype(jnp.bfloat16)            # (C*64, 32)
    # conv2: one (32, 64) weight per (ki, kj) tap
    c2_w = jnp.transpose(p["c2_w"], (2, 3, 1, 0)).reshape(n_k, 32, 64).astype(jnp.bfloat16)
    # conv3 (folded into head): rows in (kh, kw, C) order == flatten of conv2 out
    c3_w = jnp.transpose(p["c3_w"], (2, 3, 1, 0)).reshape(n_pix * 64, 64).astype(jnp.bfloat16)

    # fc1: [advantage | value] concatenated along the output dim -> 1024 wide
    h1_w = jnp.concatenate([p["a1_w"], p["v1_w"]], axis=1)              # (64, 1024)
    h1_b = jnp.concatenate([p["a1_b"], p["v1_b"]]).reshape(1, 1024)
    # fc2: block-diagonal (1024, 128) -> [adv 64 | val 64]
    h2_w = jnp.zeros((1024, 128), jnp.float32)
    h2_w = h2_w.at[:512, :64].set(p["a2_w"]).at[512:, 64:].set(p["v2_w"])
    h2_b = jnp.concatenate([p["a2_b"], p["v2_b"]]).reshape(1, 128)
    # fc3: block-diagonal, padded to 128 lanes: cols [0:A]=adv, [A]=val
    h3_w = jnp.zeros((128, 128), jnp.float32)
    h3_w = h3_w.at[:64, :A].set(p["a3_w"]).at[64:, A:A + 1].set(p["v3_w"])
    h3_b = jnp.zeros((1, 128), jnp.float32)
    h3_b = h3_b.at[0, :A].set(p["a3_b"]).at[0, A].set(p["v3_b"][0])

    kp = {
        "row_idx": row_idx,
        "c1_w": c1_w, "c1_b": p["c1_b"].reshape(1, -1),
        "c2_w": c2_w, "c2_b": p["c2_b"].reshape(1, -1),
        "c3_w": c3_w, "c3_b": p["c3_b"].reshape(1, -1),
        "h1_w": h1_w.astype(jnp.bfloat16), "h1_b": h1_b,
        "h2_w": h2_w.astype(jnp.bfloat16), "h2_b": h2_b,
        "h3_w": h3_w.astype(jnp.bfloat16), "h3_b": h3_b,
    }
    cfg = {"h1o": h1o, "w1o": w1o, "n_pix": n_pix, "blk": blk, "n_k": n_k,
           "A": A}
    return kp, cfg


# ----------------------------------------------------------------------------
# Forward pass (mirrors DQN.forward; NCHW only at the external boundary)
# ----------------------------------------------------------------------------
def dqn_forward(kp, x, *, cfg):
    N = x.shape[0]
    xb = x.astype(jnp.bfloat16)
    # All conv1 patches in ONE XLA op; patch features ordered (C, kh, kw),
    # output already channel-last.
    patches = lax.conv_general_dilated_patches(
        xb, filter_shape=(8, 8), window_strides=(4, 4), padding="VALID",
        dimension_numbers=("NCHW", "OIHW", "NHWC"))          # (N, 8, 8, C*64)
    patches = patches.reshape(N, cfg["h1o"] * cfg["w1o"], patches.shape[-1])
    # Pre-gather rows into conv2-window order (16 taps x 16-row blocks) so the
    # fused kernel never needs strided gathers / reshapes.
    p1e = jnp.take(patches, kp["row_idx"], axis=1)           # (N, 256, C*64)

    # Fused conv1 + conv2 (one pallas_call, activations VMEM-resident).
    c2 = conv12(p1e, kp, n_k=cfg["n_k"], n_pix=cfg["n_pix"], blk=cfg["blk"])

    # conv3's im2col is a pure (h, w, C) flatten of the conv2 output.
    flat = c2.reshape(N, cfg["n_pix"] * 64)

    # Fused conv3 + fc stack (both dueling heads) + dueling combine.
    return fused_head(flat, kp, num_actions=cfg["A"])


# ----------------------------------------------------------------------------
if __name__ == "__main__":
    # 36x36 survives the conv stack: (36-8)/4+1=8, (8-4)/2+1=3, (3-3)/1+1=1
    input_shape = (4, 36, 36)
    num_actions = 6
    batch = 2

    key = jax.random.PRNGKey(0)
    pkey, xkey = jax.random.split(key)
    torch_layout_params = init_dqn_params(pkey, input_shape, num_actions)
    kparams, cfg = prepare_kernel_params(torch_layout_params, input_shape,
                                         num_actions)
    x = jax.random.normal(xkey, (batch,) + input_shape, dtype=jnp.float32)

    fwd = jax.jit(functools.partial(dqn_forward, cfg=cfg))
    out = jax.block_until_ready(fwd(kparams, x))
    assert out.shape == (batch, num_actions) and out.dtype == jnp.float32
    assert bool(jnp.all(jnp.isfinite(out)))
    print("KERNEL_OK")
</pallas_src>

<mosaic_0001>
module attributes {stable_mosaic.version = 11 : i64} {
  func.func @_conv12_kernel(%arg0: i32, %arg1: memref<1x256x256xbf16, #tpu.memory_space<vmem>>, %arg2: memref<256x32xbf16, #tpu.memory_space<vmem>>, %arg3: memref<1x32xf32, #tpu.memory_space<vmem>>, %arg4: memref<16x32x64xbf16, #tpu.memory_space<vmem>>, %arg5: memref<1x64xf32, #tpu.memory_space<vmem>>, %arg6: memref<1x9x64xbf16, #tpu.memory_space<vmem>>) attributes {dimension_semantics = [#tpu.dimension_semantics<parallel>], iteration_bounds = array<i64: 2>, scalar_prefetch = 0 : i64, scratch_operands = 0 : i64, tpu.core_type = #tpu.core_type<tc>, window_params = [{transform_indices = @transform_0, window_bounds = array<i64: 1, 256, 256>}, {pipeline_mode = #tpu.pipeline_mode<synchronous>, transform_indices = @transform_1, window_bounds = array<i64: 256, 32>}, {pipeline_mode = #tpu.pipeline_mode<synchronous>, transform_indices = @transform_2, window_bounds = array<i64: 1, 32>}, {pipeline_mode = #tpu.pipeline_mode<synchronous>, transform_indices = @transform_3, window_bounds = array<i64: 16, 32, 64>}, {pipeline_mode = #tpu.pipeline_mode<synchronous>, transform_indices = @transform_4, window_bounds = array<i64: 1, 64>}, {transform_indices = @transform_5, window_bounds = array<i64: 1, 9, 64>}]} {
    %c0 = arith.constant 0 : index
    %c0_0 = arith.constant 0 : index
    %c0_1 = arith.constant 0 : index
    %0 = vector.load %arg1[%c0, %c0_0, %c0_1] : memref<1x256x256xbf16, #tpu.memory_space<vmem>>, vector<1x256x256xbf16>
    %1 = vector.shape_cast %0 : vector<1x256x256xbf16> to vector<256x256xbf16>
    %c0_2 = arith.constant 0 : index
    %c0_3 = arith.constant 0 : index
    %2 = vector.load %arg2[%c0_2, %c0_3] : memref<256x32xbf16, #tpu.memory_space<vmem>>, vector<256x32xbf16>
    %cst = arith.constant dense<0.000000e+00> : vector<256x32xf32>
    %3 = tpu.matmul %1, %2, %cst {dimension_numbers = #tpu.dot_dimension_numbers<[1], [0], [0], [1], [0, 0, 1, 1], [], []>} : vector<256x256xbf16>, vector<256x32xbf16>, vector<256x32xf32> -> vector<256x32xf32>
    %c0_4 = arith.constant 0 : index
    %c0_5 = arith.constant 0 : index
    %4 = vector.load %arg3[%c0_4, %c0_5] : memref<1x32xf32, #tpu.memory_space<vmem>>, vector<1x32xf32>
    %5 = vector.broadcast %4 : vector<1x32xf32> to vector<256x32xf32>
    %6 = arith.addf %3, %5 : vector<256x32xf32>
    %cst_6 = arith.constant 0.000000e+00 : f32
    %7 = vector.broadcast %cst_6 : f32 to vector<256x32xf32>
    %8 = arith.maximumf %6, %7 : vector<256x32xf32>
    %9 = arith.truncf %8 : vector<256x32xf32> to vector<256x32xbf16>
    %cst_7 = arith.constant 0.000000e+00 : f32
    %10 = vector.broadcast %cst_7 : f32 to vector<16x64xf32>
    %11 = vector.extract_strided_slice %9 {offsets = [0, 0], sizes = [16, 32], strides = [1, 1]} : vector<256x32xbf16> to vector<16x32xbf16>
    %c0_8 = arith.constant 0 : index
    %c0_9 = arith.constant 0 : index
    %c0_10 = arith.constant 0 : index
    %12 = vector.load %arg4[%c0_8, %c0_9, %c0_10] : memref<16x32x64xbf16, #tpu.memory_space<vmem>>, vector<1x32x64xbf16>
    %13 = vector.shape_cast %12 : vector<1x32x64xbf16> to vector<32x64xbf16>
    %cst_11 = arith.constant dense<0.000000e+00> : vector<16x64xf32>
    %14 = tpu.matmul %11, %13, %cst_11 {dimension_numbers = #tpu.dot_dimension_numbers<[1], [0], [0], [1], [0, 0, 1, 1], [], []>} : vector<16x32xbf16>, vector<32x64xbf16>, vector<16x64xf32> -> vector<16x64xf32>
    %15 = arith.addf %10, %14 : vector<16x64xf32>
    %16 = vector.extract_strided_slice %9 {offsets = [16, 0], sizes = [16, 32], strides = [1, 1]} : vector<256x32xbf16> to vector<16x32xbf16>
    %c1 = arith.constant 1 : index
    %c0_12 = arith.constant 0 : index
    %c0_13 = arith.constant 0 : index
    %17 = vector.load %arg4[%c1, %c0_12, %c0_13] : memref<16x32x64xbf16, #tpu.memory_space<vmem>>, vector<1x32x64xbf16>
    %18 = vector.shape_cast %17 : vector<1x32x64xbf16> to vector<32x64xbf16>
    %cst_14 = arith.constant dense<0.000000e+00> : vector<16x64xf32>
    %19 = tpu.matmul %16, %18, %cst_14 {dimension_numbers = #tpu.dot_dimension_numbers<[1], [0], [0], [1], [0, 0, 1, 1], [], []>} : vector<16x32xbf16>, vector<32x64xbf16>, vector<16x64xf32> -> vector<16x64xf32>
    %20 = arith.addf %15, %19 : vector<16x64xf32>
    %21 = vector.extract_strided_slice %9 {offsets = [32, 0], sizes = [16, 32], strides = [1, 1]} : vector<256x32xbf16> to vector<16x32xbf16>
    %c2 = arith.constant 2 : index
    %c0_15 = arith.constant 0 : index
    %c0_16 = arith.constant 0 : index
    %22 = vector.load %arg4[%c2, %c0_15, %c0_16] : memref<16x32x64xbf16, #tpu.memory_space<vmem>>, vector<1x32x64xbf16>
    %23 = vector.shape_cast %22 : vector<1x32x64xbf16> to vector<32x64xbf16>
    %cst_17 = arith.constant dense<0.000000e+00> : vector<16x64xf32>
    %24 = tpu.matmul %21, %23, %cst_17 {dimension_numbers = #tpu.dot_dimension_numbers<[1], [0], [0], [1], [0, 0, 1, 1], [], []>} : vector<16x32xbf16>, vector<32x64xbf16>, vector<16x64xf32> -> vector<16x64xf32>
    %25 = arith.addf %20, %24 : vector<16x64xf32>
    %26 = vector.extract_strided_slice %9 {offsets = [48, 0], sizes = [16, 32], strides = [1, 1]} : vector<256x32xbf16> to vector<16x32xbf16>
    %c3 = arith.constant 3 : index
    %c0_18 = arith.constant 0 : index
    %c0_19 = arith.constant 0 : index
    %27 = vector.load %arg4[%c3, %c0_18, %c0_19] : memref<16x32x64xbf16, #tpu.memory_space<vmem>>, vector<1x32x64xbf16>
    %28 = vector.shape_cast %27 : vector<1x32x64xbf16> to vector<32x64xbf16>
    %cst_20 = arith.constant dense<0.000000e+00> : vector<16x64xf32>
    %29 = tpu.matmul %26, %28, %cst_20 {dimension_numbers = #tpu.dot_dimension_numbers<[1], [0], [0], [1], [0, 0, 1, 1], [], []>} : vector<16x32xbf16>, vector<32x64xbf16>, vector<16x64xf32> -> vector<16x64xf32>
    %30 = arith.addf %25, %29 : vector<16x64xf32>
    %31 = vector.extract_strided_slice %9 {offsets = [64, 0], sizes = [16, 32], strides = [1, 1]} : vector<256x32xbf16> to vector<16x32xbf16>
    %c4 = arith.constant 4 : index
    %c0_21 = arith.constant 0 : index
    %c0_22 = arith.constant 0 : index
    %32 = vector.load %arg4[%c4, %c0_21, %c0_22] : memref<16x32x64xbf16, #tpu.memory_space<vmem>>, vector<1x32x64xbf16>
    %33 = vector.shape_cast %32 : vector<1x32x64xbf16> to vector<32x64xbf16>
    %cst_23 = arith.constant dense<0.000000e+00> : vector<16x64xf32>
    %34 = tpu.matmul %31, %33, %cst_23 {dimension_numbers = #tpu.dot_dimension_numbers<[1], [0], [0], [1], [0, 0, 1, 1], [], []>} : vector<16x32xbf16>, vector<32x64xbf16>, vector<16x64xf32> -> vector<16x64xf32>
    %35 = arith.addf %30, %34 : vector<16x64xf32>
    %36 = vector.extract_strided_slice %9 {offsets = [80, 0], sizes = [16, 32], strides = [1, 1]} : vector<256x32xbf16> to vector<16x32xbf16>
    %c5 = arith.constant 5 : index
    %c0_24 = arith.constant 0 : index
    %c0_25 = arith.constant 0 : index
    %37 = vector.load %arg4[%c5, %c0_24, %c0_25] : memref<16x32x64xbf16, #tpu.memory_space<vmem>>, vector<1x32x64xbf16>
    %38 = vector.shape_cast %37 : vector<1x32x64xbf16> to vector<32x64xbf16>
    %cst_26 = arith.constant dense<0.000000e+00> : vector<16x64xf32>
    %39 = tpu.matmul %36, %38, %cst_26 {dimension_numbers = #tpu.dot_dimension_numbers<[1], [0], [0], [1], [0, 0, 1, 1], [], []>} : vector<16x32xbf16>, vector<32x64xbf16>, vector<16x64xf32> -> vector<16x64xf32>
    %40 = arith.addf %35, %39 : vector<16x64xf32>
    %41 = vector.extract_strided_slice %9 {offsets = [96, 0], sizes = [16, 32], strides = [1, 1]} : vector<256x32xbf16> to vector<16x32xbf16>
    %c6 = arith.constant 6 : index
    %c0_27 = arith.constant 0 : index
    %c0_28 = arith.constant 0 : index
    %42 = vector.load %arg4[%c6, %c0_27, %c0_28] : memref<16x32x64xbf16, #tpu.memory_space<vmem>>, vector<1x32x64xbf16>
    %43 = vector.shape_cast %42 : vector<1x32x64xbf16> to vector<32x64xbf16>
    %cst_29 = arith.constant dense<0.000000e+00> : vector<16x64xf32>
    %44 = tpu.matmul %41, %43, %cst_29 {dimension_numbers = #tpu.dot_dimension_numbers<[1], [0], [0], [1], [0, 0, 1, 1], [], []>} : vector<16x32xbf16>, vector<32x64xbf16>, vector<16x64xf32> -> vector<16x64xf32>
    %45 = arith.addf %40, %44 : vector<16x64xf32>
    %46 = vector.extract_strided_slice %9 {offsets = [112, 0], sizes = [16, 32], strides = [1, 1]} : vector<256x32xbf16> to vector<16x32xbf16>
    %c7 = arith.constant 7 : index
    %c0_30 = arith.constant 0 : index
    %c0_31 = arith.constant 0 : index
    %47 = vector.load %arg4[%c7, %c0_30, %c0_31] : memref<16x32x64xbf16, #tpu.memory_space<vmem>>, vector<1x32x64xbf16>
    %48 = vector.shape_cast %47 : vector<1x32x64xbf16> to vector<32x64xbf16>
    %cst_32 = arith.constant dense<0.000000e+00> : vector<16x64xf32>
    %49 = tpu.matmul %46, %48, %cst_32 {dimension_numbers = #tpu.dot_dimension_numbers<[1], [0], [0], [1], [0, 0, 1, 1], [], []>} : vector<16x32xbf16>, vector<32x64xbf16>, vector<16x64xf32> -> vector<16x64xf32>
    %50 = arith.addf %45, %49 : vector<16x64xf32>
    %51 = vector.extract_strided_slice %9 {offsets = [128, 0], sizes = [16, 32], strides = [1, 1]} : vector<256x32xbf16> to vector<16x32xbf16>
    %c8 = arith.constant 8 : index
    %c0_33 = arith.constant 0 : index
    %c0_34 = arith.constant 0 : index
    %52 = vector.load %arg4[%c8, %c0_33, %c0_34] : memref<16x32x64xbf16, #tpu.memory_space<vmem>>, vector<1x32x64xbf16>
    %53 = vector.shape_cast %52 : vector<1x32x64xbf16> to vector<32x64xbf16>
    %cst_35 = arith.constant dense<0.000000e+00> : vector<16x64xf32>
    %54 = tpu.matmul %51, %53, %cst_35 {dimension_numbers = #tpu.dot_dimension_numbers<[1], [0], [0], [1], [0, 0, 1, 1], [], []>} : vector<16x32xbf16>, vector<32x64xbf16>, vector<16x64xf32> -> vector<16x64xf32>
    %55 = arith.addf %50, %54 : vector<16x64xf32>
    %56 = vector.extract_strided_slice %9 {offsets = [144, 0], sizes = [16, 32], strides = [1, 1]} : vector<256x32xbf16> to vector<16x32xbf16>
    %c9 = arith.constant 9 : index
    %c0_36 = arith.constant 0 : index
    %c0_37 = arith.constant 0 : index
    %57 = vector.load %arg4[%c9, %c0_36, %c0_37] : memref<16x32x64xbf16, #tpu.memory_space<vmem>>, vector<1x32x64xbf16>
    %58 = vector.shape_cast %57 : vector<1x32x64xbf16> to vector<32x64xbf16>
    %cst_38 = arith.constant dense<0.000000e+00> : vector<16x64xf32>
    %59 = tpu.matmul %56, %58, %cst_38 {dimension_numbers = #tpu.dot_dimension_numbers<[1], [0], [0], [1], [0, 0, 1, 1], [], []>} : vector<16x32xbf16>, vector<32x64xbf16>, vector<16x64xf32> -> vector<16x64xf32>
    %60 = arith.addf %55, %59 : vector<16x64xf32>
    %61 = vector.extract_strided_slice %9 {offsets = [160, 0], sizes = [16, 32], strides = [1, 1]} : vector<256x32xbf16> to vector<16x32xbf16>
    %c10 = arith.constant 10 : index
    %c0_39 = arith.constant 0 : index
    %c0_40 = arith.constant 0 : index
    %62 = vector.load %arg4[%c10, %c0_39, %c0_40] : memref<16x32x64xbf16, #tpu.memory_space<vmem>>, vector<1x32x64xbf16>
    %63 = vector.shape_cast %62 : vector<1x32x64xbf16> to vector<32x64xbf16>
    %cst_41 = arith.constant dense<0.000000e+00> : vector<16x64xf32>
    %64 = tpu.matmul %61, %63, %cst_41 {dimension_numbers = #tpu.dot_dimension_numbers<[1], [0], [0], [1], [0, 0, 1, 1], [], []>} : vector<16x32xbf16>, vector<32x64xbf16>, vector<16x64xf32> -> vector<16x64xf32>
    %65 = arith.addf %60, %64 : vector<16x64xf32>
    %66 = vector.extract_strided_slice %9 {offsets = [176, 0], sizes = [16, 32], strides = [1, 1]} : vector<256x32xbf16> to vector<16x32xbf16>
    %c11 = arith.constant 11 : index
    %c0_42 = arith.constant 0 : index
    %c0_43 = arith.constant 0 : index
    %67 = vector.load %arg4[%c11, %c0_42, %c0_43] : memref<16x32x64xbf16, #tpu.memory_space<vmem>>, vector<1x32x64xbf16>
    %68 = vector.shape_cast %67 : vector<1x32x64xbf16> to vector<32x64xbf16>
    %cst_44 = arith.constant dense<0.000000e+00> : vector<16x64xf32>
    %69 = tpu.matmul %66, %68, %cst_44 {dimension_numbers = #tpu.dot_dimension_numbers<[1], [0], [0], [1], [0, 0, 1, 1], [], []>} : vector<16x32xbf16>, vector<32x64xbf16>, vector<16x64xf32> -> vector<16x64xf32>
    %70 = arith.addf %65, %69 : vector<16x64xf32>
    %71 = vector.extract_strided_slice %9 {offsets = [192, 0], sizes = [16, 32], strides = [1, 1]} : vector<256x32xbf16> to vector<16x32xbf16>
    %c12 = arith.constant 12 : index
    %c0_45 = arith.constant 0 : index
    %c0_46 = arith.constant 0 : index
    %72 = vector.load %arg4[%c12, %c0_45, %c0_46] : memref<16x32x64xbf16, #tpu.memory_space<vmem>>, vector<1x32x64xbf16>
    %73 = vector.shape_cast %72 : vector<1x32x64xbf16> to vector<32x64xbf16>
    %cst_47 = arith.constant dense<0.000000e+00> : vector<16x64xf32>
    %74 = tpu.matmul %71, %73, %cst_47 {dimension_numbers = #tpu.dot_dimension_numbers<[1], [0], [0], [1], [0, 0, 1, 1], [], []>} : vector<16x32xbf16>, vector<32x64xbf16>, vector<16x64xf32> -> vector<16x64xf32>
    %75 = arith.addf %70, %74 : vector<16x64xf32>
    %76 = vector.extract_strided_slice %9 {offsets = [208, 0], sizes = [16, 32], strides = [1, 1]} : vector<256x32xbf16> to vector<16x32xbf16>
    %c13 = arith.constant 13 : index
    %c0_48 = arith.constant 0 : index
    %c0_49 = arith.constant 0 : index
    %77 = vector.load %arg4[%c13, %c0_48, %c0_49] : memref<16x32x64xbf16, #tpu.memory_space<vmem>>, vector<1x32x64xbf16>
    %78 = vector.shape_cast %77 : vector<1x32x64xbf16> to vector<32x64xbf16>
    %cst_50 = arith.constant dense<0.000000e+00> : vector<16x64xf32>
    %79 = tpu.matmul %76, %78, %cst_50 {dimension_numbers = #tpu.dot_dimension_numbers<[1], [0], [0], [1], [0, 0, 1, 1], [], []>} : vector<16x32xbf16>, vector<32x64xbf16>, vector<16x64xf32> -> vector<16x64xf32>
    %80 = arith.addf %75, %79 : vector<16x64xf32>
    %81 = vector.extract_strided_slice %9 {offsets = [224, 0], sizes = [16, 32], strides = [1, 1]} : vector<256x32xbf16> to vector<16x32xbf16>
    %c14 = arith.constant 14 : index
    %c0_51 = arith.constant 0 : index
    %c0_52 = arith.constant 0 : index
    %82 = vector.load %arg4[%c14, %c0_51, %c0_52] : memref<16x32x64xbf16, #tpu.memory_space<vmem>>, vector<1x32x64xbf16>
    %83 = vector.shape_cast %82 : vector<1x32x64xbf16> to vector<32x64xbf16>
    %cst_53 = arith.constant dense<0.000000e+00> : vector<16x64xf32>
    %84 = tpu.matmul %81, %83, %cst_53 {dimension_numbers = #tpu.dot_dimension_numbers<[1], [0], [0], [1], [0, 0, 1, 1], [], []>} : vector<16x32xbf16>, vector<32x64xbf16>, vector<16x64xf32> -> vector<16x64xf32>
    %85 = arith.addf %80, %84 : vector<16x64xf32>
    %86 = vector.extract_strided_slice %9 {offsets = [240, 0], sizes = [16, 32], strides = [1, 1]} : vector<256x32xbf16> to vector<16x32xbf16>
    %c15 = arith.constant 15 : index
    %c0_54 = arith.constant 0 : index
    %c0_55 = arith.constant 0 : index
    %87 = vector.load %arg4[%c15, %c0_54, %c0_55] : memref<16x32x64xbf16, #tpu.memory_space<vmem>>, vector<1x32x64xbf16>
    %88 = vector.shape_cast %87 : vector<1x32x64xbf16> to vector<32x64xbf16>
    %cst_56 = arith.constant dense<0.000000e+00> : vector<16x64xf32>
    %89 = tpu.matmul %86, %88, %cst_56 {dimension_numbers = #tpu.dot_dimension_numbers<[1], [0], [0], [1], [0, 0, 1, 1], [], []>} : vector<16x32xbf16>, vector<32x64xbf16>, vector<16x64xf32> -> vector<16x64xf32>
    %90 = arith.addf %85, %89 : vector<16x64xf32>
    %91 = vector.extract_strided_slice %90 {offsets = [0, 0], sizes = [9, 64], strides = [1, 1]} : vector<16x64xf32> to vector<9x64xf32>
    %c0_57 = arith.constant 0 : index
    %c0_58 = arith.constant 0 : index
    %92 = vector.load %arg5[%c0_57, %c0_58] : memref<1x64xf32, #tpu.memory_space<vmem>>, vector<1x64xf32>
    %93 = vector.broadcast %92 : vector<1x64xf32> to vector<9x64xf32>
    %94 = arith.addf %91, %93 : vector<9x64xf32>
    %cst_59 = arith.constant 0.000000e+00 : f32
    %95 = vector.broadcast %cst_59 : f32 to vector<9x64xf32>
    %96 = arith.maximumf %94, %95 : vector<9x64xf32>
    %97 = arith.truncf %96 : vector<9x64xf32> to vector<9x64xbf16>
    %c0_60 = arith.constant 0 : index
    %c0_61 = arith.constant 0 : index
    %c0_62 = arith.constant 0 : index
    %98 = vector.load %arg6[%c0_60, %c0_61, %c0_62] : memref<1x9x64xbf16, #tpu.memory_space<vmem>>, vector<1x9x64xbf16>
    %99 = vector.shape_cast %98 : vector<1x9x64xbf16> to vector<9x64xbf16>
    %100 = vector.shape_cast %97 : vector<9x64xbf16> to vector<1x9x64xbf16>
    tpu.vector_store %arg6[%c0_60, %c0_61, %c0_62], %100 {strides = array<i32>} : memref<1x9x64xbf16, #tpu.memory_space<vmem>>, vector<1x9x64xbf16>,
    return
  }
  func.func @transform_0(%arg0: i32) -> (i32, i32, i32) {
    %c0_i32 = arith.constant 0 : i32
    %c0_i32_0 = arith.constant 0 : i32
    %c0_i32_1 = arith.constant 0 : i32
    return %arg0, %c0_i32, %c0_i32_0 : i32, i32, i32
  }
  func.func @transform_1(%arg0: i32) -> (i32, i32) {
    %c0_i32 = arith.constant 0 : i32
    %c0_i32_0 = arith.constant 0 : i32
    %c0_i32_1 = arith.constant 0 : i32
    return %c0_i32, %c0_i32_0 : i32, i32
  }
  func.func @transform_2(%arg0: i32) -> (i32, i32) {
    %c0_i32 = arith.constant 0 : i32
    %c0_i32_0 = arith.constant 0 : i32
    %c0_i32_1 = arith.constant 0 : i32
    return %c0_i32, %c0_i32_0 : i32, i32
  }
  func.func @transform_3(%arg0: i32) -> (i32, i32, i32) {
    %c0_i32 = arith.constant 0 : i32
    %c0_i32_0 = arith.constant 0 : i32
    %c0_i32_1 = arith.constant 0 : i32
    %c0_i32_2 = arith.constant 0 : i32
    return %c0_i32, %c0_i32_0, %c0_i32_1 : i32, i32, i32
  }
  func.func @transform_4(%arg0: i32) -> (i32, i32) {
    %c0_i32 = arith.constant 0 : i32
    %c0_i32_0 = arith.constant 0 : i32
    %c0_i32_1 = arith.constant 0 : i32
    return %c0_i32, %c0_i32_0 : i32, i32
  }
  func.func @transform_5(%arg0: i32) -> (i32, i32, i32) {
    %c0_i32 = arith.constant 0 : i32
    %c0_i32_0 = arith.constant 0 : i32
    %c0_i32_1 = arith.constant 0 : i32
    return %arg0, %c0_i32, %c0_i32_0 : i32, i32, i32
  }
}

module attributes {stable_mosaic.version = 11 : i64} {
  func.func @_head_kernel(%arg0: i32, %arg1: memref<16x576xbf16, #tpu.memory_space<vmem>>, %arg2: memref<576x64xbf16, #tpu.memory_space<vmem>>, %arg3: memref<1x64xf32, #tpu.memory_space<vmem>>, %arg4: memref<64x1024xbf16, #tpu.memory_space<vmem>>, %arg5: memref<1x1024xf32, #tpu.memory_space<vmem>>, %arg6: memref<1024x128xbf16, #tpu.memory_space<vmem>>, %arg7: memref<1x128xf32, #tpu.memory_space<vmem>>, %arg8: memref<128x128xbf16, #tpu.memory_space<vmem>>, %arg9: memref<1x128xf32, #tpu.memory_space<vmem>>, %arg10: memref<16x128xf32, #tpu.memory_space<vmem>>) attributes {dimension_semantics = [#tpu.dimension_semantics<parallel>], iteration_bounds = array<i64: 1>, scalar_prefetch = 0 : i64, scratch_operands = 0 : i64, tpu.core_type = #tpu.core_type<tc>, window_params = [{transform_indices = @transform_0, window_bounds = array<i64: 16, 576>}, {pipeline_mode = #tpu.pipeline_mode<synchronous>, transform_indices = @transform_1, window_bounds = array<i64: 576, 64>}, {pipeline_mode = #tpu.pipeline_mode<synchronous>, transform_indices = @transform_2, window_bounds = array<i64: 1, 64>}, {pipeline_mode = #tpu.pipeline_mode<synchronous>, transform_indices = @transform_3, window_bounds = array<i64: 64, 1024>}, {pipeline_mode = #tpu.pipeline_mode<synchronous>, transform_indices = @transform_4, window_bounds = array<i64: 1, 1024>}, {pipeline_mode = #tpu.pipeline_mode<synchronous>, transform_indices = @transform_5, window_bounds = array<i64: 1024, 128>}, {pipeline_mode = #tpu.pipeline_mode<synchronous>, transform_indices = @transform_6, window_bounds = array<i64: 1, 128>}, {pipeline_mode = #tpu.pipeline_mode<synchronous>, transform_indices = @transform_7, window_bounds = array<i64: 128, 128>}, {pipeline_mode = #tpu.pipeline_mode<synchronous>, transform_indices = @transform_8, window_bounds = array<i64: 1, 128>}, {transform_indices = @transform_9, window_bounds = array<i64: 16, 128>}]} {
    %c0 = arith.constant 0 : index
    %c0_0 = arith.constant 0 : index
    %0 = vector.load %arg1[%c0, %c0_0] : memref<16x576xbf16, #tpu.memory_space<vmem>>, vector<16x576xbf16>
    %c0_1 = arith.constant 0 : index
    %c0_2 = arith.constant 0 : index
    %1 = vector.load %arg2[%c0_1, %c0_2] : memref<576x64xbf16, #tpu.memory_space<vmem>>, vector<576x64xbf16>
    %cst = arith.constant dense<0.000000e+00> : vector<16x64xf32>
    %2 = tpu.matmul %0, %1, %cst {dimension_numbers = #tpu.dot_dimension_numbers<[1], [0], [0], [1], [0, 0, 1, 1], [], []>} : vector<16x576xbf16>, vector<576x64xbf16>, vector<16x64xf32> -> vector<16x64xf32>
    %c0_3 = arith.constant 0 : index
    %c0_4 = arith.constant 0 : index
    %3 = vector.load %arg3[%c0_3, %c0_4] : memref<1x64xf32, #tpu.memory_space<vmem>>, vector<1x64xf32>
    %4 = vector.broadcast %3 : vector<1x64xf32> to vector<16x64xf32>
    %5 = arith.addf %2, %4 : vector<16x64xf32>
    %cst_5 = arith.constant 0.000000e+00 : f32
    %6 = vector.broadcast %cst_5 : f32 to vector<16x64xf32>
    %7 = arith.maximumf %5, %6 : vector<16x64xf32>
    %8 = arith.truncf %7 : vector<16x64xf32> to vector<16x64xbf16>
    %c0_6 = arith.constant 0 : index
    %c0_7 = arith.constant 0 : index
    %9 = vector.load %arg4[%c0_6, %c0_7] : memref<64x1024xbf16, #tpu.memory_space<vmem>>, vector<64x1024xbf16>
    %cst_8 = arith.constant dense<0.000000e+00> : vector<16x1024xf32>
    %10 = tpu.matmul %8, %9, %cst_8 {dimension_numbers = #tpu.dot_dimension_numbers<[1], [0], [0], [1], [0, 0, 1, 1], [], []>} : vector<16x64xbf16>, vector<64x1024xbf16>, vector<16x1024xf32> -> vector<16x1024xf32>
    %c0_9 = arith.constant 0 : index
    %c0_10 = arith.constant 0 : index
    %11 = vector.load %arg5[%c0_9, %c0_10] : memref<1x1024xf32, #tpu.memory_space<vmem>>, vector<1x1024xf32>
    %12 = vector.broadcast %11 : vector<1x1024xf32> to vector<16x1024xf32>
    %13 = arith.addf %10, %12 : vector<16x1024xf32>
    %cst_11 = arith.constant 0.000000e+00 : f32
    %14 = vector.broadcast %cst_11 : f32 to vector<16x1024xf32>
    %15 = arith.maximumf %13, %14 : vector<16x1024xf32>
    %16 = arith.truncf %15 : vector<16x1024xf32> to vector<16x1024xbf16>
    %c0_12 = arith.constant 0 : index
    %c0_13 = arith.constant 0 : index
    %17 = vector.load %arg6[%c0_12, %c0_13] : memref<1024x128xbf16, #tpu.memory_space<vmem>>, vector<1024x128xbf16>
    %cst_14 = arith.constant dense<0.000000e+00> : vector<16x128xf32>
    %18 = tpu.matmul %16, %17, %cst_14 {dimension_numbers = #tpu.dot_dimension_numbers<[1], [0], [0], [1], [0, 0, 1, 1], [], []>} : vector<16x1024xbf16>, vector<1024x128xbf16>, vector<16x128xf32> -> vector<16x128xf32>
    %c0_15 = arith.constant 0 : index
    %c0_16 = arith.constant 0 : index
    %19 = vector.load %arg7[%c0_15, %c0_16] : memref<1x128xf32, #tpu.memory_space<vmem>>, vector<1x128xf32>
    %20 = vector.broadcast %19 : vector<1x128xf32> to vector<16x128xf32>
    %21 = arith.addf %18, %20 : vector<16x128xf32>
    %cst_17 = arith.constant 0.000000e+00 : f32
    %22 = vector.broadcast %cst_17 : f32 to vector<16x128xf32>
    %23 = arith.maximumf %21, %22 : vector<16x128xf32>
    %24 = arith.truncf %23 : vector<16x128xf32> to vector<16x128xbf16>
    %c0_18 = arith.constant 0 : index
    %c0_19 = arith.constant 0 : index
    %25 = vector.load %arg8[%c0_18, %c0_19] : memref<128x128xbf16, #tpu.memory_space<vmem>>, vector<128x128xbf16>
    %cst_20 = arith.constant dense<0.000000e+00> : vector<16x128xf32>
    %26 = tpu.matmul %24, %25, %cst_20 {dimension_numbers = #tpu.dot_dimension_numbers<[1], [0], [0], [1], [0, 0, 1, 1], [], []>} : vector<16x128xbf16>, vector<128x128xbf16>, vector<16x128xf32> -> vector<16x128xf32>
    %c0_21 = arith.constant 0 : index
    %c0_22 = arith.constant 0 : index
    %27 = vector.load %arg9[%c0_21, %c0_22] : memref<1x128xf32, #tpu.memory_space<vmem>>, vector<1x128xf32>
    %28 = vector.broadcast %27 : vector<1x128xf32> to vector<16x128xf32>
    %29 = arith.addf %26, %28 : vector<16x128xf32>
    %30 = tpu.iota {dimensions = array<i32: 1>} : vector<16x128xi32>
    %c6_i32 = arith.constant 6 : i32
    %31 = vector.broadcast %c6_i32 : i32 to vector<16x128xi32>
    %32 = arith.cmpi slt, %30, %31 : vector<16x128xi32>
    %cst_23 = arith.constant 0.000000e+00 : f32
    %33 = vector.broadcast %cst_23 : f32 to vector<16x128xf32>
    %34 = arith.select %32, %29, %33 : vector<16x128xi1>, vector<16x128xf32>
    %cst_24 = arith.constant dense<0.000000e+00> : vector<16xf32>
    %35 = vector.multi_reduction <add>, %34, %cst_24 [1] : vector<16x128xf32> to vector<16xf32>
    %36 = vector.shape_cast %35 : vector<16xf32> to vector<16x1xf32>
    %cst_25 = arith.constant 0.166666672 : f32
    %37 = vector.broadcast %cst_25 : f32 to vector<16x1xf32>
    %38 = arith.mulf %36, %37 : vector<16x1xf32>
    %c6_i32_26 = arith.constant 6 : i32
    %39 = vector.broadcast %c6_i32_26 : i32 to vector<16x128xi32>
    %40 = arith.cmpi eq, %30, %39 : vector<16x128xi32>
    %cst_27 = arith.constant 0.000000e+00 : f32
    %41 = vector.broadcast %cst_27 : f32 to vector<16x128xf32>
    %42 = arith.select %40, %29, %41 : vector<16x128xi1>, vector<16x128xf32>
    %cst_28 = arith.constant dense<0.000000e+00> : vector<16xf32>
    %43 = vector.multi_reduction <add>, %42, %cst_28 [1] : vector<16x128xf32> to vector<16xf32>
    %44 = vector.shape_cast %43 : vector<16xf32> to vector<16x1xf32>
    %45 = vector.broadcast %44 : vector<16x1xf32> to vector<16x128xf32>
    %46 = arith.addf %45, %29 : vector<16x128xf32>
    %47 = vector.broadcast %38 : vector<16x1xf32> to vector<16x128xf32>
    %48 = arith.subf %46, %47 : vector<16x128xf32>
    %cst_29 = arith.constant 0.000000e+00 : f32
    %49 = vector.broadcast %cst_29 : f32 to vector<16x128xf32>
    %50 = arith.select %32, %48, %49 : vector<16x128xi1>, vector<16x128xf32>
    %c0_30 = arith.constant 0 : index
    %c0_31 = arith.constant 0 : index
    %51 = vector.load %arg10[%c0_30, %c0_31] : memref<16x128xf32, #tpu.memory_space<vmem>>, vector<16x128xf32>
    tpu.vector_store %arg10[%c0_30, %c0_31], %50 {strides = array<i32>} : memref<16x128xf32, #tpu.memory_space<vmem>>, vector<16x128xf32>,
    return
  }
  func.func @transform_0(%arg0: i32) -> (i32, i32) {
    %c0_i32 = arith.constant 0 : i32
    %c0_i32_0 = arith.constant 0 : i32
    return %arg0, %c0_i32 : i32, i32
  }
  func.func @transform_1(%arg0: i32) -> (i32, i32) {
    %c0_i32 = arith.constant 0 : i32
    %c0_i32_0 = arith.constant 0 : i32
    %c0_i32_1 = arith.constant 0 : i32
    return %c0_i32, %c0_i32_0 : i32, i32
  }
  func.func @transform_2(%arg0: i32) -> (i32, i32) {
    %c0_i32 = arith.constant 0 : i32
    %c0_i32_0 = arith.constant 0 : i32
    %c0_i32_1 = arith.constant 0 : i32
    return %c0_i32, %c0_i32_0 : i32, i32
  }
  func.func @transform_3(%arg0: i32) -> (i32, i32) {
    %c0_i32 = arith.constant 0 : i32
    %c0_i32_0 = arith.constant 0 : i32
    %c0_i32_1 = arith.constant 0 : i32
    return %c0_i32, %c0_i32_0 : i32, i32
  }
  func.func @transform_4(%arg0: i32) -> (i32, i32) {
    %c0_i32 = arith.constant 0 : i32
    %c0_i32_0 = arith.constant 0 : i32
    %c0_i32_1 = arith.constant 0 : i32
    return %c0_i32, %c0_i32_0 : i32, i32
  }
  func.func @transform_5(%arg0: i32) -> (i32, i32) {
    %c0_i32 = arith.constant 0 : i32
    %c0_i32_0 = arith.constant 0 : i32
    %c0_i32_1 = arith.constant 0 : i32
    return %c0_i32, %c0_i32_0 : i32, i32
  }
  func.func @transform_6(%arg0: i32) -> (i32, i32) {
    %c0_i32 = arith.constant 0 : i32
    %c0_i32_0 = arith.constant 0 : i32
    %c0_i32_1 = arith.constant 0 : i32
    return %c0_i32, %c0_i32_0 : i32, i32
  }
  func.func @transform_7(%arg0: i32) -> (i32, i32) {
    %c0_i32 = arith.constant 0 : i32
    %c0_i32_0 = arith.constant 0 : i32
    %c0_i32_1 = arith.constant 0 : i32
    return %c0_i32, %c0_i32_0 : i32, i32
  }
  func.func @transform_8(%arg0: i32) -> (i32, i32) {
    %c0_i32 = arith.constant 0 : i32
    %c0_i32_0 = arith.constant 0 : i32
    %c0_i32_1 = arith.constant 0 : i32
    return %c0_i32, %c0_i32_0 : i32, i32
  }
  func.func @transform_9(%arg0: i32) -> (i32, i32) {
    %c0_i32 = arith.constant 0 : i32
    %c0_i32_0 = arith.constant 0 : i32
    return %arg0, %c0_i32 : i32, i32
  }
}

</mosaic_0001>

<bundles_post_ra>
// kernel: dqn_forward.2
= control target key start
LH: loop header
LB: loop body
LE: loop exit
PB: predicated region body
PF: predicated region fallthrough
CT: control target
= control target key end

     0   :  { %s2457_s18 = smov 0   ;;  %s2776_s0 = inlined_call_operand.vmem [shape: bf16[2,256,256], index: 0, kind: input, shape index: {}]   ;;  %s2777_s1 = inlined_call_operand.vmem [shape: bf16[256,32], index: 1, kind: input, shape index: {}]   ;;  %s2778_s2 = inlined_call_operand.vmem [shape: f32[1,32], index: 2, kind: input, shape index: {}]   ;;  %s2779_s3 = inlined_call_operand.vmem [shape: bf16[16,32,64], index: 3, kind: input, shape index: {}]   ;;  %s2780_s4 = inlined_call_operand.vmem [shape: f32[1,64], index: 4, kind: input, shape index: {}]   ;;  %s2781_s5 = inlined_call_operand.vmem [shape: bf16[2,9,64], index: 5, kind: output, shape index: {}]  }
   0x1 LB: > { %s1848_s19 = sadd.s32 4294967295, %s2423_s18   ;;  %p1852_p0 = scmp.ge.s32.totalorder %s2423_s18, 1  ;;  %s2423_s18 = sphi %s2457_s18, %s15_s18  }
   0x2   : > { %p187_p1 = scmp.lt.s32.totalorder %s2423_s18, 3 }
   0x4   : > { %p188_p2 = pnand %p1852_p0, %p187_p1 }
   0x5   : > { %v2321_v0 = vld [vmem:[%s2777_s1 + $0x40] sm:$0xff] (!%p188_p2)   ;;  %v2323_v2 = vld [vmem:[%s2777_s1 + $0x48] sm:$0xff] (!%p188_p2)   ;;  %p215_p3 = scmp.lt.s32.totalorder (!%p188_p2), %s1848_s19, 1  ;;  %v2325_v4 = vld [vmem:[%s2777_s1 + $0x50] sm:$0xff] (!%p188_p2)   ;;  %v2425_v44 = vmov (!%p188_p2), 0.0   ;;  %vm2426_vm0 = vmmov (!%p188_p2), 0  }
   0x6   : > { %191 = sbr.rel (%p188_p2) target bundleno = 613 (0x265), region = 40  ;;  %v2322_v1 = vld [vmem:[%s2777_s1] sm:$0xff] (!%p188_p2)   ;;  %2023 = vmatprep.subr.bf16.mxu0 (!%p188_p2), %v2321_v0  ;;  %v2324_v3 = vld [vmem:[%s2777_s1 + $0x8] sm:$0xff] (!%p188_p2)   ;;  %v2326_v5 = vld [vmem:[%s2777_s1 + $0x10] sm:$0xff] (!%p188_p2)   ;;  %2183 = vmatprep.subr.bf16.mxu1 (!%p188_p2), %v2425_v44  ;;  %vm783_vm1 = vcmask (!%p188_p2), 261120   ;;  %vm1787_vm2 = vcmask (!%p188_p2), 516096  }
   0x7   : > { %2024 = vmatpush3.bf16.msra.mxu0 (!%p188_p2), %v2322_v1  ;;  %v2327_v6 = vld [vmem:[%s2777_s1 + $0x58] sm:$0xff] (!%p188_p2)   ;;  %v2329_v8 = vld [vmem:[%s2777_s1 + $0x60] sm:$0xff] (!%p188_p2)   ;;  %v2331_v10 = vld [vmem:[%s2777_s1 + $0x68] sm:$0xff] (!%p188_p2)   ;;  %2187 = vmatprep.mubr.msk.bf16.mxu1 (!%p188_p2), %vm2426_vm0, %v2425_v44  ;;  %vm1788_vm3 = vsmask.f32 (!%p188_p2), 256  ;;  %vm1785_vm4 = vcmask (!%p188_p2), 519168  }
   0x8   : > { %2025 = vmatprep.subr.bf16.mxu0 (!%p188_p2), %v2323_v2  ;;  %v2328_v7 = vld [vmem:[%s2777_s1 + $0x18] sm:$0xff] (!%p188_p2)   ;;  %v2330_v9 = vld [vmem:[%s2777_s1 + $0x20] sm:$0xff] (!%p188_p2)   ;;  %v2332_v12 = vld [vmem:[%s2777_s1 + $0x28] sm:$0xff] (!%p188_p2)  }
   0x9   : > { %v2333_v13 = vld [vmem:[%s2777_s1 + $0x70] sm:$0xff] (!%p188_p2)   ;;  %v2335_v15 = vld [vmem:[%s2777_s1 + $0x78] sm:$0xff] (!%p188_p2)   ;;  %v2567_v52 = vld [vmem:[%s2778_s2] ss:$0 sm:$0xff] (!%p188_p2) }
   0xa   : > { %v2334_v14 = vld [vmem:[%s2777_s1 + $0x30] sm:$0xff] (!%p188_p2)   ;;  %v2336_v16 = vld [vmem:[%s2777_s1 + $0x38] sm:$0xff] (!%p188_p2)   ;;  %vm1789_vm5 = vmand (!%p188_p2), %vm1787_vm2, %vm1788_vm3 }
   0xb   : > { %2026 = vmatpush3.bf16.msra.mxu0 (!%p188_p2), %v2324_v3  ;;  %v2385_v43 = vld [vmem:[%s2779_s3 + $0x10] sm:$0xff] (!%p188_p2)   ;;  %v2386_v45 = vld [vmem:[%s2779_s3 + $0x18] sm:$0xff] (!%p188_p2)  }
   0xc   : > { %2027 = vmatprep.subr.bf16.mxu0 (!%p188_p2), %v2325_v4  ;;  %2184 = vmatpush3.bf16.msra.mxu1 (!%p188_p2), %v2385_v43 }
   0xd   : > { %s2783_s19 = smov (!%p215_p3, %s1848_s19), 1  ;;  %2185 = vmatprep.subr.bf16.mxu1 %v2425_v44 }
   0xe   : > { %s2019_s11 = sshll.u32 %s2783_s19, 8  ;;  %s2020_s7 = sshll.u32 %s2783_s19, 3 }
   0xf   : > { %2028 = vmatpush3.bf16.msra.mxu0 %v2326_v5  ;;  %s2498_s16 = scalar_lea.vmem %s2776_s0, %s2019_s11  ;;  %s224_s10 = scalar_lea.vmem %s2781_s5, %s2020_s7 }
  0x10   : > { %2029 = vmatprep.subr.bf16.mxu0 %v2327_v6  ;;  %v2339_v11 = vld [vmem:[%s2498_s16 + $0x4] ss:$8 sps:$4 sm:$0xff]   ;;  %v2337_v17 = vld [vmem:[%s2498_s16] ss:$8 sps:$4 sm:$0xff]   ;;  %v2340_v18 = vld [vmem:[%s2498_s16 + $0x14] ss:$8 sps:$4 sm:$0xff]   ;;  %2186 = vmatpush3.bf16.msra.mxu1 %v2386_v45 }
  0x11   : > { %585 = vmatprep.mubr.bf16.mxu0 %v2339_v11  ;;  %v2342_v19 = vld [vmem:[%s2498_s16 + $0x10] ss:$8 sps:$4 sm:$0xff]   ;;  %v2343_v20 = vld [vmem:[%s2498_s16 + $0x24] ss:$8 sps:$4 sm:$0xff]   ;;  %v2345_v21 = vld [vmem:[%s2498_s16 + $0x20] ss:$8 sps:$4 sm:$0xff]   ;;  %2191 = vmatprep.subr.bf16.mxu1 %v2425_v44 }
  0x12   : > { %v2346_v22 = vld [vmem:[%s2498_s16 + $0x34] ss:$8 sps:$4 sm:$0xff]   ;;  %v2348_v23 = vld [vmem:[%s2498_s16 + $0x30] ss:$8 sps:$4 sm:$0xff]   ;;  %v2349_v24 = vld [vmem:[%s2498_s16 + $0x44] ss:$8 sps:$4 sm:$0xff]  }
  0x13   : > { %2030 = vmatpush3.bf16.msra.mxu0 %v2328_v7  ;;  %v2351_v25 = vld [vmem:[%s2498_s16 + $0x40] ss:$8 sps:$4 sm:$0xff]   ;;  %v2352_v26 = vld [vmem:[%s2498_s16 + $0x54] ss:$8 sps:$4 sm:$0xff]   ;;  %v2354_v27 = vld [vmem:[%s2498_s16 + $0x50] ss:$8 sps:$4 sm:$0xff]  }
  0x14   : > { %2031 = vmatprep.subr.bf16.mxu0 %v2329_v8  ;;  %v2355_v28 = vld [vmem:[%s2498_s16 + $0x64] ss:$8 sps:$4 sm:$0xff]   ;;  %v2357_v29 = vld [vmem:[%s2498_s16 + $0x60] ss:$8 sps:$4 sm:$0xff]   ;;  %v2358_v30 = vld [vmem:[%s2498_s16 + $0x74] ss:$8 sps:$4 sm:$0xff]  }
  0x15   : > { %v2360_v31 = vld [vmem:[%s2498_s16 + $0x70] ss:$8 sps:$4 sm:$0xff]   ;;  %v2361_v32 = vld [vmem:[%s2498_s16 + $0x84] ss:$8 sps:$4 sm:$0xff]   ;;  %v2363_v33 = vld [vmem:[%s2498_s16 + $0x80] ss:$8 sps:$4 sm:$0xff]  }
  0x16   : > { %v2364_v34 = vld [vmem:[%s2498_s16 + $0x94] ss:$8 sps:$4 sm:$0xff]   ;;  %v2366_v35 = vld [vmem:[%s2498_s16 + $0x90] ss:$8 sps:$4 sm:$0xff]   ;;  %v2367_v36 = vld [vmem:[%s2498_s16 + $0xa4] ss:$8 sps:$4 sm:$0xff]  }
  0x17   : > { %2032 = vmatpush3.bf16.msra.mxu0 %v2330_v9  ;;  %v2369_v37 = vld [vmem:[%s2498_s16 + $0xa0] ss:$8 sps:$4 sm:$0xff]   ;;  %v2370_v38 = vld [vmem:[%s2498_s16 + $0xb4] ss:$8 sps:$4 sm:$0xff]   ;;  %v2372_v39 = vld [vmem:[%s2498_s16 + $0xb0] ss:$8 sps:$4 sm:$0xff]  }
  0x18   : > { %2033 = vmatprep.subr.bf16.mxu0 %v2331_v10  ;;  %v2373_v40 = vld [vmem:[%s2498_s16 + $0xc4] ss:$8 sps:$4 sm:$0xff]   ;;  %v2375_v41 = vld [vmem:[%s2498_s16 + $0xc0] ss:$8 sps:$4 sm:$0xff]   ;;  %v2376_v42 = vld [vmem:[%s2498_s16 + $0xd4] ss:$8 sps:$4 sm:$0xff]  }
  0x19   : > { %v2378_v46 = vld [vmem:[%s2498_s16 + $0xd0] ss:$8 sps:$4 sm:$0xff]   ;;  %v2379_v47 = vld [vmem:[%s2498_s16 + $0xe4] ss:$8 sps:$4 sm:$0xff]   ;;  %v2381_v48 = vld [vmem:[%s2498_s16 + $0xe0] ss:$8 sps:$4 sm:$0xff]  }
  0x1a   : > { %v2382_v49 = vld [vmem:[%s2498_s16 + $0xf4] ss:$8 sps:$4 sm:$0xff]   ;;  %v2384_v50 = vld [vmem:[%s2498_s16 + $0xf0] ss:$8 sps:$4 sm:$0xff]   ;;  %v2387_v10 = vld [vmem:[%s2779_s3] sm:$0xff]  }
  0x1b   : > { %2034 = vmatpush3.bf16.msra.mxu0 %v2332_v12  ;;  %v2392_v45 = vld [vmem:[%s2779_s3 + $0x38] sm:$0xff]  }
  0x1c   : > { %2035 = vmatprep.subr.bf16.mxu0 %v2333_v13 }
  0x1f   : > { %2036 = vmatpush3.bf16.msra.mxu0 %v2334_v14 }
  0x20   : > { %2037 = vmatprep.subr.bf16.mxu0 %v2335_v15 }
  0x23   : > { %2038 = vmatpush3.bf16.msra.mxu0 %v2336_v16 }
  0x26   : > { %586 = vmatmul.mubr.bf16.vlgmr.msra.gmra.mrb[0].mxu0 %v2337_v17 }
  0x27   : > { %593 = vmatprep.mubr.bf16.mxu0 %v2340_v18  ;;  %v2388_v18 = vld [vmem:[%s2779_s3 + $0x8] sm:$0xff]  }
  0x2e   : > { %594 = vmatmul.mubr.bf16.gmra.mrb[4].mxu0 %v2342_v19 }
  0x2f   : > { %601 = vmatprep.mubr.bf16.mxu0 %v2343_v20 }
  0x36   : > { %602 = vmatmul.mubr.bf16.gmra.mrb[8].mxu0 %v2345_v21 }
  0x37   : > { %609 = vmatprep.mubr.bf16.mxu0 %v2346_v22 }
  0x3e   : > { %610 = vmatmul.mubr.bf16.gmra.mrb[12].mxu0 %v2348_v23  ;;  %v2389_v23 = vld [vmem:[%s2779_s3 + $0x20] sm:$0xff]  }
  0x3f   : > { %617 = vmatprep.mubr.bf16.mxu0 %v2349_v24 }
  0x46   : > { %618 = vmatmul.mubr.bf16.gmra.mrb[16].mxu0 %v2351_v25 }
  0x47   : > { %625 = vmatprep.mubr.bf16.mxu0 %v2352_v26 }
  0x4e   : > { %626 = vmatmul.mubr.bf16.gmra.mrb[20].mxu0 %v2354_v27 }
  0x4f   : > { %633 = vmatprep.mubr.bf16.mxu0 %v2355_v28 }
  0x56   : > { %634 = vmatmul.mubr.bf16.gmra.mrb[24].mxu0 %v2357_v29 }
  0x57   : > { %641 = vmatprep.mubr.bf16.mxu0 %v2358_v30 }
  0x5e   : > { %642 = vmatmul.mubr.bf16.gmra.mrb[28].mxu0 %v2360_v31  ;;  %v2390_v31 = vld [vmem:[%s2779_s3 + $0x28] sm:$0xff]  }
  0x5f   : > { %649 = vmatprep.mubr.bf16.mxu0 %v2361_v32 }
  0x66   : > { %650 = vmatmul.mubr.bf16.gmra.mrb[32].mxu0 %v2363_v33 }
  0x67   : > { %657 = vmatprep.mubr.bf16.mxu0 %v2364_v34 }
  0x6e   : > { %658 = vmatmul.mubr.bf16.gmra.mrb[36].mxu0 %v2366_v35 }
  0x6f   : > { %665 = vmatprep.mubr.bf16.mxu0 %v2367_v36  ;;  %v2391_v36 = vld [vmem:[%s2779_s3 + $0x30] sm:$0xff]  }
  0x76   : > { %666 = vmatmul.mubr.bf16.gmra.mrb[40].mxu0 %v2369_v37 }
  0x77   : > { %673 = vmatprep.mubr.bf16.mxu0 %v2370_v38 }
  0x7e   : > { %674 = vmatmul.mubr.bf16.gmra.mrb[44].mxu0 %v2372_v39 }
  0x7f   : > { %681 = vmatprep.mubr.bf16.mxu0 %v2373_v40 }
  0x86   : > { %682 = vmatmul.mubr.bf16.gmra.mrb[48].mxu0 %v2375_v41 }
  0x87   : > { %689 = vmatprep.mubr.bf16.mxu0 %v2376_v42 }
  0x8e   : > { %690 = vmatmul.mubr.bf16.gmra.mrb[52].mxu0 %v2378_v46 }
  0x8f   : > { %697 = vmatprep.mubr.bf16.mxu0 %v2379_v47 }
  0x96   : > { %698 = vmatmul.mubr.bf16.gmra.mrb[56].mxu0 %v2381_v48 }
  0x97   : > { %705 = vmatprep.mubr.bf16.mxu0 %v2382_v49 }
  0x9e   : > { %706 = vmatmul.mubr.bf16.gmra.mrb[60].mxu0 %v2384_v50  ;;  %v2393_v50 = vld [vmem:[%s2779_s3 + $0x40] sm:$0xff]  }
  0xf9   : > { %v2039_v51 = vpop.f32.mrb[0].mxu0 }
  0xfa   : > { %v2040_v53 = vpop.f32.mrb[1].mxu0 }
  0xfb   : > { %v2041_v54 = vadd.f32 %v2040_v53, %v2039_v51  ;;  %v2042_v55 = vpop.f32.mrb[2].mxu0 }
  0xfc   : > { %v2043_v56 = vpop.f32.mrb[3].mxu0 }
  0xfd   : > { %v588_v57 = vadd.f32 %v2041_v54, %v2567_v52  ;;  %v2044_v58 = vadd.f32 %v2043_v56, %v2042_v55 }
  0xff   : > { %v591_v59 = vadd.f32 %v2044_v58, %v2567_v52  ;;  %v714_v60 = vmax.f32 %v588_v57, 0.0 }
 0x101   : > { %v715_v61 = vmax.f32 %v591_v59, 0.0  ;;  %v2045_v62 = vpop.f32.mrb[4].mxu0  ;;  %v2394_v59 = vld [vmem:[%s2779_s3 + $0x48] sm:$0xff]  }
 0x102   : > { %v2046_v63 = vpop.f32.mrb[5].mxu0 }
 0x103   : > { %v746_v0 = vpack.c.bf16 %v715_v61, %v714_v60  ;;  %v2047_v1 = vadd.f32 %v2046_v63, %v2045_v62  ;;  %v2048_v2 = vpop.f32.mrb[6].mxu0 }
 0x104   : > { %v2049_v3 = vpop.f32.mrb[7].mxu0 }
 0x105   : > { %v596_v4 = vadd.f32 %v2047_v1, %v2567_v52  ;;  %v2050_v5 = vadd.f32 %v2049_v3, %v2048_v2 }
 0x107   : > { %v599_v6 = vadd.f32 %v2050_v5, %v2567_v52  ;;  %v716_v7 = vmax.f32 %v596_v4, 0.0 }
 0x109   : > { %v717_v8 = vmax.f32 %v599_v6, 0.0  ;;  %v2051_v9 = vpop.f32.mrb[8].mxu0 }
 0x10a   : > { %v2052_v11 = vpop.f32.mrb[9].mxu0 }
 0x10b   : > { %v747_v12 = vpack.c.bf16 %v717_v8, %v716_v7  ;;  %v2053_v13 = vadd.f32 %v2052_v11, %v2051_v9  ;;  %v2054_v14 = vpop.f32.mrb[10].mxu0  ;;  %v2396_v8 = vld [vmem:[%s2779_s3 + $0x58] sm:$0xff]  }
 0x10c   : > { %v2055_v15 = vpop.f32.mrb[11].mxu0 }
 0x10d   : > { %2188 = vmatmul.mubr.msk.bf16.vlgmr.msra.gmra.mrb[0].mxu1 %vm783_vm1, %v747_v12  ;;  %v604_v16 = vadd.f32 %v2053_v13, %v2567_v52  ;;  %v2056_v17 = vadd.f32 %v2055_v15, %v2054_v14  ;;  %v2397_v13 = vld [vmem:[%s2779_s3 + $0x60] sm:$0xff]  }
 0x10e   : > { %2192 = vmatpush3.bf16.msra.mxu1 %v2387_v10  ;;  %2195 = vmatprep.mubr.msk.bf16.mxu1 %vm2426_vm0, %v2425_v44 }
 0x10f   : > { %v718_v19 = vmax.f32 %v604_v16, 0.0  ;;  %2193 = vmatprep.subr.bf16.mxu1 %v2425_v44  ;;  %v607_v20 = vadd.f32 %v2056_v17, %v2567_v52 }
 0x111   : > { %v719_v21 = vmax.f32 %v607_v20, 0.0  ;;  %v2057_v22 = vpop.f32.mrb[12].mxu0 }
 0x112   : > { %2194 = vmatpush3.bf16.msra.mxu1 %v2388_v18  ;;  %v2058_v24 = vpop.f32.mrb[13].mxu0 }
 0x113   : > { %v748_v25 = vpack.c.bf16 %v719_v21, %v718_v19  ;;  %2199 = vmatprep.subr.bf16.mxu1 %v2425_v44  ;;  %v2059_v26 = vadd.f32 %v2058_v24, %v2057_v22  ;;  %v2060_v27 = vpop.f32.mrb[14].mxu0  ;;  %v2398_v21 = vld [vmem:[%s2779_s3 + $0x68] sm:$0xff]  }
 0x114   : > { %v2061_v28 = vpop.f32.mrb[15].mxu0 }
 0x115   : > { %2196 = vmatmul.mubr.msk.bf16.vlgmr.msra.gmra.mrb[4].mxu1 %vm783_vm1, %v746_v0  ;;  %v612_v29 = vadd.f32 %v2059_v26, %v2567_v52  ;;  %v2062_v30 = vadd.f32 %v2061_v28, %v2060_v27  ;;  %v2395_v0 = vld [vmem:[%s2779_s3 + $0x50] sm:$0xff]  }
 0x116   : > { %2200 = vmatpush3.bf16.msra.mxu1 %v2389_v23  ;;  %2203 = vmatprep.mubr.msk.bf16.mxu1 %vm2426_vm0, %v2425_v44  ;;  %v2399_v26 = vld [vmem:[%s2779_s3 + $0x70] sm:$0xff]  }
 0x117   : > { %v720_v32 = vmax.f32 %v612_v29, 0.0  ;;  %2201 = vmatprep.subr.bf16.mxu1 %v2425_v44  ;;  %v615_v33 = vadd.f32 %v2062_v30, %v2567_v52 }
 0x119   : > { %v721_v34 = vmax.f32 %v615_v33, 0.0  ;;  %v2063_v35 = vpop.f32.mrb[16].mxu0 }
 0x11a   : > { %2202 = vmatpush3.bf16.msra.mxu1 %v2390_v31  ;;  %v2064_v37 = vpop.f32.mrb[17].mxu0 }
 0x11b   : > { %v749_v38 = vpack.c.bf16 %v721_v34, %v720_v32  ;;  %2207 = vmatprep.subr.bf16.mxu1 %v2425_v44  ;;  %v2065_v39 = vadd.f32 %v2064_v37, %v2063_v35  ;;  %v2066_v40 = vpop.f32.mrb[18].mxu0  ;;  %v2400_v34 = vld [vmem:[%s2779_s3 + $0x78] sm:$0xff]  }
 0x11c   : > { %v2067_v41 = vpop.f32.mrb[19].mxu0 }
 0x11d   : > { %2204 = vmatmul.mubr.msk.bf16.vlgmr.msra.gmra.mrb[8].mxu1 %vm783_vm1, %v748_v25  ;;  %v620_v42 = vadd.f32 %v2065_v39, %v2567_v52  ;;  %v2068_v43 = vadd.f32 %v2067_v41, %v2066_v40  ;;  %v2401_v39 = vld [vmem:[%s2779_s3 + $0x80] sm:$0xff]  }
 0x11e   : > { %2208 = vmatpush3.bf16.msra.mxu1 %v2391_v36  ;;  %2211 = vmatprep.mubr.msk.bf16.mxu1 %vm2426_vm0, %v2425_v44 }
 0x11f   : > { %v722_v46 = vmax.f32 %v620_v42, 0.0  ;;  %2209 = vmatprep.subr.bf16.mxu1 %v2425_v44  ;;  %v623_v47 = vadd.f32 %v2068_v43, %v2567_v52 }
 0x121   : > { %v723_v48 = vmax.f32 %v623_v47, 0.0  ;;  %v2069_v49 = vpop.f32.mrb[20].mxu0 }
 0x122   : > { %2210 = vmatpush3.bf16.msra.mxu1 %v2392_v45  ;;  %v2070_v51 = vpop.f32.mrb[21].mxu0 }
 0x123   : > { %v750_v53 = vpack.c.bf16 %v723_v48, %v722_v46  ;;  %2215 = vmatprep.subr.bf16.mxu1 %v2425_v44  ;;  %v2071_v54 = vadd.f32 %v2070_v51, %v2069_v49  ;;  %v2072_v55 = vpop.f32.mrb[22].mxu0  ;;  %v2402_v48 = vld [vmem:[%s2779_s3 + $0x88] sm:$0xff]  }
 0x124   : > { %v2073_v56 = vpop.f32.mrb[23].mxu0 }
 0x125   : > { %2212 = vmatmul.mubr.msk.bf16.vlgmr.msra.gmra.mrb[12].mxu1 %vm783_vm1, %v749_v38  ;;  %v628_v57 = vadd.f32 %v2071_v54, %v2567_v52  ;;  %v2074_v58 = vadd.f32 %v2073_v56, %v2072_v55  ;;  %v2403_v54 = vld [vmem:[%s2779_s3 + $0x90] sm:$0xff]  }
 0x126   : > { %2216 = vmatpush3.bf16.msra.mxu1 %v2393_v50  ;;  %2219 = vmatprep.mubr.msk.bf16.mxu1 %vm2426_vm0, %v2425_v44 }
 0x127   : > { %v724_v60 = vmax.f32 %v628_v57, 0.0  ;;  %2217 = vmatprep.subr.bf16.mxu1 %v2425_v44  ;;  %v631_v61 = vadd.f32 %v2074_v58, %v2567_v52 }
 0x129   : > { %v725_v62 = vmax.f32 %v631_v61, 0.0  ;;  %v2075_v63 = vpop.f32.mrb[24].mxu0 }
 0x12a   : > { %2218 = vmatpush3.bf16.msra.mxu1 %v2394_v59  ;;  %v2076_v1 = vpop.f32.mrb[25].mxu0 }
 0x12b   : > { %v751_v2 = vpack.c.bf16 %v725_v62, %v724_v60  ;;  %2223 = vmatprep.subr.bf16.mxu1 %v2425_v44  ;;  %v2077_v3 = vadd.f32 %v2076_v1, %v2075_v63  ;;  %v2078_v4 = vpop.f32.mrb[26].mxu0  ;;  %v2404_v62 = vld [vmem:[%s2779_s3 + $0x98] sm:$0xff]  }
 0x12c   : > { %v2079_v5 = vpop.f32.mrb[27].mxu0 }
 0x12d   : > { %2220 = vmatmul.mubr.msk.bf16.vlgmr.msra.gmra.mrb[16].mxu1 %vm783_vm1, %v750_v53  ;;  %v636_v6 = vadd.f32 %v2077_v3, %v2567_v52  ;;  %v2080_v7 = vadd.f32 %v2079_v5, %v2078_v4  ;;  %v2405_v3 = vld [vmem:[%s2779_s3 + $0xa0] sm:$0xff]  }
 0x12e   : > { %2224 = vmatpush3.bf16.msra.mxu1 %v2395_v0  ;;  %2227 = vmatprep.mubr.msk.bf16.mxu1 %vm2426_vm0, %v2425_v44 }
 0x12f   : > { %v726_v9 = vmax.f32 %v636_v6, 0.0  ;;  %2225 = vmatprep.subr.bf16.mxu1 %v2425_v44  ;;  %v639_v10 = vadd.f32 %v2080_v7, %v2567_v52 }
 0x131   : > { %v727_v11 = vmax.f32 %v639_v10, 0.0  ;;  %v2081_v12 = vpop.f32.mrb[28].mxu0 }
 0x132   : > { %2226 = vmatpush3.bf16.msra.mxu1 %v2396_v8  ;;  %v2082_v14 = vpop.f32.mrb[29].mxu0 }
 0x133   : > { %v752_v15 = vpack.c.bf16 %v727_v11, %v726_v9  ;;  %2231 = vmatprep.subr.bf16.mxu1 %v2425_v44  ;;  %v2083_v16 = vadd.f32 %v2082_v14, %v2081_v12  ;;  %v2084_v17 = vpop.f32.mrb[30].mxu0  ;;  %v2406_v11 = vld [vmem:[%s2779_s3 + $0xa8] sm:$0xff]  }
 0x134   : > { %v2085_v18 = vpop.f32.mrb[31].mxu0 }
 0x135   : > { %2228 = vmatmul.mubr.msk.bf16.vlgmr.msra.gmra.mrb[20].mxu1 %vm783_vm1, %v751_v2  ;;  %v644_v19 = vadd.f32 %v2083_v16, %v2567_v52  ;;  %v2086_v20 = vadd.f32 %v2085_v18, %v2084_v17  ;;  %v2407_v16 = vld [vmem:[%s2779_s3 + $0xb0] sm:$0xff]  }
 0x136   : > { %2232 = vmatpush3.bf16.msra.mxu1 %v2397_v13  ;;  %2235 = vmatprep.mubr.msk.bf16.mxu1 %vm2426_vm0, %v2425_v44 }
 0x137   : > { %v728_v22 = vmax.f32 %v644_v19, 0.0  ;;  %2233 = vmatprep.subr.bf16.mxu1 %v2425_v44  ;;  %v647_v23 = vadd.f32 %v2086_v20, %v2567_v52 }
 0x139   : > { %v729_v24 = vmax.f32 %v647_v23, 0.0  ;;  %v2087_v25 = vpop.f32.mrb[32].mxu0 }
 0x13a   : > { %2234 = vmatpush3.bf16.msra.mxu1 %v2398_v21  ;;  %v2088_v27 = vpop.f32.mrb[33].mxu0 }
 0x13b   : > { %v753_v28 = vpack.c.bf16 %v729_v24, %v728_v22  ;;  %2239 = vmatprep.subr.bf16.mxu1 %v2425_v44  ;;  %v2089_v29 = vadd.f32 %v2088_v27, %v2087_v25  ;;  %v2090_v30 = vpop.f32.mrb[34].mxu0  ;;  %v2408_v24 = vld [vmem:[%s2779_s3 + $0xb8] sm:$0xff]  }
 0x13c   : > { %v2091_v31 = vpop.f32.mrb[35].mxu0 }
 0x13d   : > { %2236 = vmatmul.mubr.msk.bf16.vlgmr.msra.gmra.mrb[24].mxu1 %vm783_vm1, %v752_v15  ;;  %v652_v32 = vadd.f32 %v2089_v29, %v2567_v52  ;;  %v2092_v33 = vadd.f32 %v2091_v31, %v2090_v30  ;;  %v2409_v29 = vld [vmem:[%s2779_s3 + $0xc0] sm:$0xff]  }
 0x13e   : > { %2240 = vmatpush3.bf16.msra.mxu1 %v2399_v26  ;;  %2243 = vmatprep.mubr.msk.bf16.mxu1 %vm2426_vm0, %v2425_v44 }
 0x13f   : > { %v730_v35 = vmax.f32 %v652_v32, 0.0  ;;  %2241 = vmatprep.subr.bf16.mxu1 %v2425_v44  ;;  %v655_v36 = vadd.f32 %v2092_v33, %v2567_v52 }
 0x141   : > { %v731_v37 = vmax.f32 %v655_v36, 0.0  ;;  %v2093_v38 = vpop.f32.mrb[36].mxu0 }
 0x142   : > { %2242 = vmatpush3.bf16.msra.mxu1 %v2400_v34  ;;  %v2094_v40 = vpop.f32.mrb[37].mxu0 }
 0x143   : > { %v754_v41 = vpack.c.bf16 %v731_v37, %v730_v35  ;;  %2247 = vmatprep.subr.bf16.mxu1 %v2425_v44  ;;  %v2095_v42 = vadd.f32 %v2094_v40, %v2093_v38  ;;  %v2096_v43 = vpop.f32.mrb[38].mxu0  ;;  %v2410_v37 = vld [vmem:[%s2779_s3 + $0xc8] sm:$0xff]  }
 0x144   : > { %v2097_v45 = vpop.f32.mrb[39].mxu0 }
 0x145   : > { %2244 = vmatmul.mubr.msk.bf16.vlgmr.msra.gmra.mrb[28].mxu1 %vm783_vm1, %v753_v28  ;;  %v660_v46 = vadd.f32 %v2095_v42, %v2567_v52  ;;  %v2098_v47 = vadd.f32 %v2097_v45, %v2096_v43  ;;  %v2411_v42 = vld [vmem:[%s2779_s3 + $0xd0] sm:$0xff]  }
 0x146   : > { %2248 = vmatpush3.bf16.msra.mxu1 %v2401_v39  ;;  %2251 = vmatprep.mubr.msk.bf16.mxu1 %vm2426_vm0, %v2425_v44 }
 0x147   : > { %v732_v49 = vmax.f32 %v660_v46, 0.0  ;;  %2249 = vmatprep.subr.bf16.mxu1 %v2425_v44  ;;  %v663_v50 = vadd.f32 %v2098_v47, %v2567_v52 }
 0x149   : > { %v733_v51 = vmax.f32 %v663_v50, 0.0  ;;  %v2099_v53 = vpop.f32.mrb[40].mxu0 }
 0x14a   : > { %2250 = vmatpush3.bf16.msra.mxu1 %v2402_v48  ;;  %v2100_v55 = vpop.f32.mrb[41].mxu0 }
 0x14b   : > { %v755_v56 = vpack.c.bf16 %v733_v51, %v732_v49  ;;  %2255 = vmatprep.subr.bf16.mxu1 %v2425_v44  ;;  %v2101_v57 = vadd.f32 %v2100_v55, %v2099_v53  ;;  %v2102_v58 = vpop.f32.mrb[42].mxu0  ;;  %v2412_v51 = vld [vmem:[%s2779_s3 + $0xd8] sm:$0xff]  }
 0x14c   : > { %v2103_v59 = vpop.f32.mrb[43].mxu0 }
 0x14d   : > { %2252 = vmatmul.mubr.msk.bf16.vlgmr.msra.gmra.mrb[32].mxu1 %vm783_vm1, %v754_v41  ;;  %v668_v60 = vadd.f32 %v2101_v57, %v2567_v52  ;;  %v2104_v61 = vadd.f32 %v2103_v59, %v2102_v58  ;;  %v2413_v57 = vld [vmem:[%s2779_s3 + $0xe0] sm:$0xff]  }
 0x14e   : > { %2256 = vmatpush3.bf16.msra.mxu1 %v2403_v54  ;;  %2259 = vmatprep.mubr.msk.bf16.mxu1 %vm2426_vm0, %v2425_v44 }
 0x14f   : > { %v734_v63 = vmax.f32 %v668_v60, 0.0  ;;  %2257 = vmatprep.subr.bf16.mxu1 %v2425_v44  ;;  %v671_v0 = vadd.f32 %v2104_v61, %v2567_v52 }
 0x151   : > { %v735_v1 = vmax.f32 %v671_v0, 0.0  ;;  %v2105_v2 = vpop.f32.mrb[44].mxu0 }
 0x152   : > { %2258 = vmatpush3.bf16.msra.mxu1 %v2404_v62  ;;  %v2106_v4 = vpop.f32.mrb[45].mxu0 }
 0x153   : > { %v756_v5 = vpack.c.bf16 %v735_v1, %v734_v63  ;;  %2263 = vmatprep.subr.bf16.mxu1 %v2425_v44  ;;  %v2107_v6 = vadd.f32 %v2106_v4, %v2105_v2  ;;  %v2108_v7 = vpop.f32.mrb[46].mxu0  ;;  %v2414_v1 = vld [vmem:[%s2779_s3 + $0xe8] sm:$0xff]  }
 0x154   : > { %v2109_v8 = vpop.f32.mrb[47].mxu0 }
 0x155   : > { %2260 = vmatmul.mubr.msk.bf16.vlgmr.msra.gmra.mrb[36].mxu1 %vm783_vm1, %v755_v56  ;;  %v676_v9 = vadd.f32 %v2107_v6, %v2567_v52  ;;  %v2110_v10 = vadd.f32 %v2109_v8, %v2108_v7  ;;  %v2416_v7 = vld [vmem:[%s2779_s3 + $0xf8] sm:$0xff]  }
 0x156   : > { %2264 = vmatpush3.bf16.msra.mxu1 %v2405_v3  ;;  %2267 = vmatprep.mubr.msk.bf16.mxu1 %vm2426_vm0, %v2425_v44 }
 0x157   : > { %v736_v12 = vmax.f32 %v676_v9, 0.0  ;;  %2265 = vmatprep.subr.bf16.mxu1 %v2425_v44  ;;  %v679_v13 = vadd.f32 %v2110_v10, %v2567_v52 }
 0x159   : > { %v737_v14 = vmax.f32 %v679_v13, 0.0  ;;  %v2111_v15 = vpop.f32.mrb[48].mxu0 }
 0x15a   : > { %2266 = vmatpush3.bf16.msra.mxu1 %v2406_v11  ;;  %v2112_v17 = vpop.f32.mrb[49].mxu0 }
 0x15b   : > { %v757_v18 = vpack.c.bf16 %v737_v14, %v736_v12  ;;  %2271 = vmatprep.subr.bf16.mxu1 %v2425_v44  ;;  %v2113_v19 = vadd.f32 %v2112_v17, %v2111_v15  ;;  %v2114_v20 = vpop.f32.mrb[50].mxu0 }
 0x15c   : > { %v2115_v21 = vpop.f32.mrb[51].mxu0 }
 0x15d   : > { %2268 = vmatmul.mubr.msk.bf16.vlgmr.msra.gmra.mrb[40].mxu1 %vm783_vm1, %v756_v5  ;;  %v684_v22 = vadd.f32 %v2113_v19, %v2567_v52  ;;  %v2116_v23 = vadd.f32 %v2115_v21, %v2114_v20  ;;  %v2415_v5 = vld [vmem:[%s2779_s3 + $0xf0] sm:$0xff]  }
 0x15e   : > { %2272 = vmatpush3.bf16.msra.mxu1 %v2407_v16  ;;  %2275 = vmatprep.mubr.msk.bf16.mxu1 %vm2426_vm0, %v2425_v44 }
 0x15f   : > { %v738_v25 = vmax.f32 %v684_v22, 0.0  ;;  %2273 = vmatprep.subr.bf16.mxu1 %v2425_v44  ;;  %v687_v26 = vadd.f32 %v2116_v23, %v2567_v52 }
 0x161   : > { %v739_v27 = vmax.f32 %v687_v26, 0.0  ;;  %v2117_v28 = vpop.f32.mrb[52].mxu0 }
 0x162   : > { %2274 = vmatpush3.bf16.msra.mxu1 %v2408_v24  ;;  %v2118_v30 = vpop.f32.mrb[53].mxu0 }
 0x163   : > { %v758_v31 = vpack.c.bf16 %v739_v27, %v738_v25  ;;  %2279 = vmatprep.subr.bf16.mxu1 %v2425_v44  ;;  %v2119_v32 = vadd.f32 %v2118_v30, %v2117_v28  ;;  %v2120_v33 = vpop.f32.mrb[54].mxu0 }
 0x164   : > { %v2121_v34 = vpop.f32.mrb[55].mxu0 }
 0x165   : > { %2276 = vmatmul.mubr.msk.bf16.vlgmr.msra.gmra.mrb[44].mxu1 %vm783_vm1, %v757_v18  ;;  %v692_v35 = vadd.f32 %v2119_v32, %v2567_v52  ;;  %v2122_v36 = vadd.f32 %v2121_v34, %v2120_v33 }
 0x166   : > { %2280 = vmatpush3.bf16.msra.mxu1 %v2409_v29  ;;  %2283 = vmatprep.mubr.msk.bf16.mxu1 %vm2426_vm0, %v2425_v44 }
 0x167   : > { %v740_v38 = vmax.f32 %v692_v35, 0.0  ;;  %2281 = vmatprep.subr.bf16.mxu1 %v2425_v44  ;;  %v695_v39 = vadd.f32 %v2122_v36, %v2567_v52 }
 0x169   : > { %v741_v40 = vmax.f32 %v695_v39, 0.0  ;;  %v2123_v41 = vpop.f32.mrb[56].mxu0 }
 0x16a   : > { %2282 = vmatpush3.bf16.msra.mxu1 %v2410_v37  ;;  %v2124_v43 = vpop.f32.mrb[57].mxu0 }
 0x16b   : > { %v759_v45 = vpack.c.bf16 %v741_v40, %v740_v38  ;;  %2287 = vmatprep.subr.bf16.mxu1 %v2425_v44  ;;  %v2125_v46 = vadd.f32 %v2124_v43, %v2123_v41  ;;  %v2126_v47 = vpop.f32.mrb[58].mxu0 }
 0x16c   : > { %v2127_v48 = vpop.f32.mrb[59].mxu0 }
 0x16d   : > { %2284 = vmatmul.mubr.msk.bf16.vlgmr.msra.gmra.mrb[48].mxu1 %vm783_vm1, %v758_v31  ;;  %v700_v49 = vadd.f32 %v2125_v46, %v2567_v52  ;;  %v2128_v50 = vadd.f32 %v2127_v48, %v2126_v47 }
 0x16e   : > { %2288 = vmatpush3.bf16.msra.mxu1 %v2411_v42  ;;  %2291 = vmatprep.mubr.msk.bf16.mxu1 %vm2426_vm0, %v2425_v44 }
 0x16f   : > { %v742_v53 = vmax.f32 %v700_v49, 0.0  ;;  %2289 = vmatprep.subr.bf16.mxu1 %v2425_v44  ;;  %v703_v54 = vadd.f32 %v2128_v50, %v2567_v52 }
 0x171   : > { %v743_v55 = vmax.f32 %v703_v54, 0.0  ;;  %v2129_v56 = vpop.f32.mrb[60].mxu0 }
 0x172   : > { %2290 = vmatpush3.bf16.msra.mxu1 %v2412_v51  ;;  %v2130_v58 = vpop.f32.mrb[61].mxu0 }
 0x173   : > { %v760_v59 = vpack.c.bf16 %v743_v55, %v742_v53  ;;  %2295 = vmatprep.subr.bf16.mxu1 %v2425_v44  ;;  %v2131_v60 = vadd.f32 %v2130_v58, %v2129_v56  ;;  %v2132_v61 = vpop.f32.mrb[62].mxu0 }
 0x174   : > { %v2133_v62 = vpop.f32.mrb[63].mxu0 }
 0x175   : > { %2292 = vmatmul.mubr.msk.bf16.vlgmr.msra.gmra.mrb[52].mxu1 %vm783_vm1, %v759_v45  ;;  %v708_v63 = vadd.f32 %v2131_v60, %v2567_v52  ;;  %v2134_v0 = vadd.f32 %v2133_v62, %v2132_v61 }
 0x176   : > { %2296 = vmatpush3.bf16.msra.mxu1 %v2413_v57  ;;  %2299 = vmatprep.mubr.msk.bf16.mxu1 %vm2426_vm0, %v2425_v44 }
 0x177   : > { %v744_v2 = vmax.f32 %v708_v63, 0.0  ;;  %2297 = vmatprep.subr.bf16.mxu1 %v2425_v44  ;;  %v711_v3 = vadd.f32 %v2134_v0, %v2567_v52 }
 0x179   : > { %v745_v4 = vmax.f32 %v711_v3, 0.0 }
 0x17a   : > { %2298 = vmatpush3.bf16.msra.mxu1 %v2414_v1 }
 0x17b   : > { %v761_v6 = vpack.c.bf16 %v745_v4, %v744_v2  ;;  %2303 = vmatprep.subr.bf16.mxu1 %v2425_v44 }
 0x17d   : > { %2300 = vmatmul.mubr.msk.bf16.vlgmr.msra.gmra.mrb[56].mxu1 %vm783_vm1, %v760_v59 }
 0x17e   : > { %2304 = vmatpush3.bf16.msra.mxu1 %v2415_v5  ;;  %2307 = vmatprep.mubr.msk.bf16.mxu1 %vm2426_vm0, %v2425_v44 }
 0x17f   : > { %2305 = vmatprep.subr.bf16.mxu1 %v2425_v44 }
 0x182   : > { %2306 = vmatpush3.bf16.msra.mxu1 %v2416_v7 }
 0x185   : > { %2308 = vmatmul.mubr.msk.bf16.vlgmr.msra.gmra.mrb[60].mxu1 %vm783_vm1, %v761_v6 }
 0x1e0   : > { %v821_v52 = vpop.f32.mrb[0].mxu1 }
 0x1e1   : > { %v2189_v8 = vpop.f32.mrb[1].mxu1 }
 0x1e2   : > { %v824_v9 = vpop.f32.mrb[2].mxu1 }
 0x1e3   : > { %v2190_v10 = vpop.f32.mrb[3].mxu1 }
 0x1e8   : > { %v877_v11 = vpop.f32.mrb[4].mxu1 }
 0x1e9   : > { %v878_v12 = vadd.f32 %v877_v11, %v821_v52  ;;  %v2197_v13 = vpop.f32.mrb[5].mxu1 }
 0x1ea   : > { %v880_v14 = vpop.f32.mrb[6].mxu1 }
 0x1eb   : > { %v881_v15 = vadd.f32 %v880_v14, %v824_v9  ;;  %v2198_v16 = vpop.f32.mrb[7].mxu1 }
 0x1f0   : > { %v938_v17 = vpop.f32.mrb[8].mxu1 }
 0x1f1   : > { %v945_v18 = vadd.f32 %v938_v17, %v878_v12  ;;  %v2205_v19 = vpop.f32.mrb[9].mxu1 }
 0x1f2   : > { %v941_v20 = vpop.f32.mrb[10].mxu1 }
 0x1f3   : > { %v946_v21 = vadd.f32 %v941_v20, %v881_v15  ;;  %v2206_v22 = vpop.f32.mrb[11].mxu1 }
 0x1f8   : > { %v1001_v44 = vpop.f32.mrb[12].mxu1 }
 0x1f9   : > { %v1008_v23 = vadd.f32 %v1001_v44, %v945_v18  ;;  %v2213_v24 = vpop.f32.mrb[13].mxu1 }
 0x1fa   : > { %v1004_v25 = vpop.f32.mrb[14].mxu1 }
 0x1fb   : > { %v1009_v26 = vadd.f32 %v1004_v25, %v946_v21  ;;  %v2214_v27 = vpop.f32.mrb[15].mxu1 }
 0x200   : > { %v1064_v28 = vpop.f32.mrb[16].mxu1 }
 0x201   : > { %v1071_v29 = vadd.f32 %v1064_v28, %v1008_v23  ;;  %v2221_v30 = vpop.f32.mrb[17].mxu1 }
 0x202   : > { %v1067_v31 = vpop.f32.mrb[18].mxu1 }
 0x203   : > { %v1072_v32 = vadd.f32 %v1067_v31, %v1009_v26  ;;  %v2222_v33 = vpop.f32.mrb[19].mxu1  ;;  %v2014_v31 = vld [vmem:[%s2780_s4] ss:$0 sm:$0xff] }
 0x208   : > { %v1127_v34 = vpop.f32.mrb[20].mxu1 }
 0x209   : > { %v1134_v35 = vadd.f32 %v1127_v34, %v1071_v29  ;;  %v2229_v36 = vpop.f32.mrb[21].mxu1 }
 0x20a   : > { %v1130_v37 = vpop.f32.mrb[22].mxu1 }
 0x20b   : > { %v1135_v38 = vadd.f32 %v1130_v37, %v1072_v32  ;;  %v2230_v39 = vpop.f32.mrb[23].mxu1 }
 0x210   : > { %v1190_v40 = vpop.f32.mrb[24].mxu1 }
 0x211   : > { %v1197_v41 = vadd.f32 %v1190_v40, %v1134_v35  ;;  %v2237_v42 = vpop.f32.mrb[25].mxu1 }
 0x212   : > { %v1193_v43 = vpop.f32.mrb[26].mxu1  ;;  %v1790_v42 = vld [vmem:[%s224_s10 + $0x4] sm:$0x1] }
 0x213   : > { %v1198_v45 = vadd.f32 %v1193_v43, %v1135_v38  ;;  %v2238_v46 = vpop.f32.mrb[27].mxu1 }
 0x218   : > { %v1253_v47 = vpop.f32.mrb[28].mxu1 }
 0x219   : > { %v1260_v48 = vadd.f32 %v1253_v47, %v1197_v41  ;;  %v2245_v49 = vpop.f32.mrb[29].mxu1 }
 0x21a   : > { %v1256_v50 = vpop.f32.mrb[30].mxu1 }
 0x21b   : > { %v1261_v51 = vadd.f32 %v1256_v50, %v1198_v45  ;;  %v2246_v53 = vpop.f32.mrb[31].mxu1 }
 0x220   : > { %v1316_v54 = vpop.f32.mrb[32].mxu1 }
 0x221   : > { %v1323_v55 = vadd.f32 %v1316_v54, %v1260_v48  ;;  %v2253_v56 = vpop.f32.mrb[33].mxu1 }
 0x222   : > { %v1319_v57 = vpop.f32.mrb[34].mxu1 }
 0x223   : > { %v1324_v58 = vadd.f32 %v1319_v57, %v1261_v51  ;;  %v2254_v59 = vpop.f32.mrb[35].mxu1 }
 0x228   : > { %v1379_v60 = vpop.f32.mrb[36].mxu1 }
 0x229   : > { %v1386_v61 = vadd.f32 %v1379_v60, %v1323_v55  ;;  %v2261_v62 = vpop.f32.mrb[37].mxu1 }
 0x22a   : > { %v1382_v63 = vpop.f32.mrb[38].mxu1 }
 0x22b   : > { %v1387_v0 = vadd.f32 %v1382_v63, %v1324_v58  ;;  %v2262_v1 = vpop.f32.mrb[39].mxu1 }
 0x230   : > { %v1442_v2 = vpop.f32.mrb[40].mxu1 }
 0x231   : > { %v1449_v3 = vadd.f32 %v1442_v2, %v1386_v61  ;;  %v2269_v4 = vpop.f32.mrb[41].mxu1 }
 0x232   : > { %v1445_v5 = vpop.f32.mrb[42].mxu1 }
 0x233   : > { %v1450_v6 = vadd.f32 %v1445_v5, %v1387_v0  ;;  %v2270_v7 = vpop.f32.mrb[43].mxu1 }
 0x238   : > { %v1505_v52 = vpop.f32.mrb[44].mxu1 }
 0x239   : > { %v1512_v8 = vadd.f32 %v1505_v52, %v1449_v3  ;;  %v2277_v9 = vpop.f32.mrb[45].mxu1 }
 0x23a   : > { %v1508_v10 = vpop.f32.mrb[46].mxu1 }
 0x23b   : > { %v1513_v11 = vadd.f32 %v1508_v10, %v1450_v6  ;;  %v2278_v12 = vpop.f32.mrb[47].mxu1 }
 0x240   : > { %v1568_v13 = vpop.f32.mrb[48].mxu1 }
 0x241   : > { %v1575_v14 = vadd.f32 %v1568_v13, %v1512_v8  ;;  %v2285_v15 = vpop.f32.mrb[49].mxu1 }
 0x242   : > { %v1571_v16 = vpop.f32.mrb[50].mxu1 }
 0x243   : > { %v1576_v17 = vadd.f32 %v1571_v16, %v1513_v11  ;;  %v2286_v18 = vpop.f32.mrb[51].mxu1 }
 0x248   : > { %v1631_v19 = vpop.f32.mrb[52].mxu1 }
 0x249   : > { %v1638_v20 = vadd.f32 %v1631_v19, %v1575_v14  ;;  %v2293_v21 = vpop.f32.mrb[53].mxu1 }
 0x24a   : > { %v1634_v22 = vpop.f32.mrb[54].mxu1 }
 0x24b   : > { %v1639_v44 = vadd.f32 %v1634_v22, %v1576_v17  ;;  %v2294_v23 = vpop.f32.mrb[55].mxu1 }
 0x250   : > { %v1694_v24 = vpop.f32.mrb[56].mxu1 }
 0x251   : > { %v1701_v25 = vadd.f32 %v1694_v24, %v1638_v20  ;;  %v2301_v26 = vpop.f32.mrb[57].mxu1 }
 0x252   : > { %v1697_v27 = vpop.f32.mrb[58].mxu1 }
 0x253   : > { %v1702_v28 = vadd.f32 %v1697_v27, %v1639_v44  ;;  %v2302_v29 = vpop.f32.mrb[59].mxu1 }
 0x258   : > { %v1757_v30 = vpop.f32.mrb[60].mxu1 }
 0x259   : > { %v1764_v32 = vadd.f32 %v1757_v30, %v1701_v25  ;;  %v2309_v33 = vpop.f32.mrb[61].mxu1 }
 0x25a   : > { %v1760_v34 = vpop.f32.mrb[62].mxu1 }
 0x25b   : > { %v1773_v35 = vadd.f32 %v2014_v31, %v1764_v32  ;;  %v1765_v36 = vadd.f32 %v1760_v34, %v1702_v28  ;;  %v2310_v37 = vpop.f32.mrb[63].mxu1 }
 0x25d   : > { %v1775_v38 = vmax.f32 %v1773_v35, 0.0  ;;  %v1774_v39 = vadd.f32 %v2014_v31, %v1765_v36 }
 0x25f   : > { %v2021_v40 = vpack.c.bf16 %v1775_v38, %v1775_v38  ;;  %v1776_v41 = vmax.f32 %v1774_v39, 0.0 }
 0x261   : > { %1786 = vst.msk [vmem:[%s224_s10] sm:$0xf] %vm1785_vm4, %v2021_v40  ;;  %v2022_v43 = vpack.c.bf16 %v1776_v41, %v1776_v41 }
 0x263   : > { %v1791_v45 = vsel %vm1789_vm5, %v2022_v43, %v1790_v42 }
 0x264   : > { %1792 = vst [vmem:[%s224_s10 + $0x4] sm:$0x1] %v1791_v45 }
 0x265 PF: > { %s15_s18 = sadd.s32 1, %s2423_s18  }
 0x266   : > { %p12_p4 = scmp.ge.s32.totalorder %s15_s18, 4  }
 0x268   :  { %14 = sbr.rel (!%p12_p4) target bundleno = 1 (0x1), region = 85 }

// kernel: dqn_forward.3
= control target key start
LH: loop header
LB: loop body
LE: loop exit
PB: predicated region body
PF: predicated region fallthrough
CT: control target
= control target key end

     0   :  { %v2199_v33 = vmov 0.0   ;;  %vm2200_vm0 = vmmov 0   ;;  %vm359_vm1 = vcmask 523264   ;;  %s2742_s1 = inlined_call_operand.vmem [shape: bf16[576,64], index: 1, kind: input, shape index: {}]   ;;  %s2743_s0 = inlined_call_operand.vmem [shape: bf16[16,576], index: 0, kind: input, shape index: {}]   ;;  %s2744_s3 = inlined_call_operand.vmem [shape: bf16[64,1024], index: 3, kind: input, shape index: {}]   ;;  %s2745_s5 = inlined_call_operand.vmem [shape: bf16[1024,128], index: 5, kind: input, shape index: {}]   ;;  %s2746_s2 = inlined_call_operand.vmem [shape: f32[1,64], index: 2, kind: input, shape index: {}]   ;;  %s2747_s4 = inlined_call_operand.vmem [shape: f32[1,1024], index: 4, kind: input, shape index: {}]   ;;  %s2748_s7 = inlined_call_operand.vmem [shape: bf16[128,128], index: 7, kind: input, shape index: {}]   ;;  %s2749_s6 = inlined_call_operand.vmem [shape: f32[1,128], index: 6, kind: input, shape index: {}]   ;;  %s2750_s8 = inlined_call_operand.vmem [shape: f32[1,128], index: 8, kind: input, shape index: {}]   ;;  %s2751_s9 = inlined_call_operand.vmem [shape: f32[16,128], index: 9, kind: output, shape index: {}]  }
   0x1   :  { %v2084_v0 = vld [vmem:[%s2742_s1 + $0x40] sm:$0xff]   ;;  %v2088_v4 = vld [vmem:[%s2742_s1 + $0x48] sm:$0xff]   ;;  %v2092_v8 = vld [vmem:[%s2742_s1 + $0x50] sm:$0xff]  }
   0x2   :  { %v2085_v1 = vld [vmem:[%s2742_s1] sm:$0xff]   ;;  %1903 = vmatprep.subr.bf16.mxu0 %v2084_v0  ;;  %v2089_v5 = vld [vmem:[%s2742_s1 + $0x8] sm:$0xff]   ;;  %v2093_v9 = vld [vmem:[%s2742_s1 + $0x10] sm:$0xff]  }
   0x3   :  { %v2086_v2 = vld [vmem:[%s2742_s1 + $0xc0] sm:$0xff]   ;;  %1904 = vmatpush3.bf16.msra.mxu0 %v2085_v1  ;;  %v2090_v6 = vld [vmem:[%s2742_s1 + $0xc8] sm:$0xff]   ;;  %v2094_v10 = vld [vmem:[%s2742_s1 + $0xd0] sm:$0xff]  }
   0x4   :  { %v2087_v3 = vld [vmem:[%s2742_s1 + $0x80] sm:$0xff]   ;;  %1925 = vmatprep.subr.bf16.mxu1 %v2086_v2  ;;  %1905 = vmatprep.subr.bf16.mxu0 %v2088_v4  ;;  %v2091_v7 = vld [vmem:[%s2742_s1 + $0x88] sm:$0xff]   ;;  %v2095_v11 = vld [vmem:[%s2742_s1 + $0x90] sm:$0xff]  }
   0x5   :  { %1926 = vmatpush3.bf16.msra.mxu1 %v2087_v3  ;;  %v2096_v12 = vld [vmem:[%s2742_s1 + $0x58] sm:$0xff]   ;;  %v2100_v16 = vld [vmem:[%s2742_s1 + $0x60] sm:$0xff]   ;;  %v2104_v20 = vld [vmem:[%s2742_s1 + $0x68] sm:$0xff]  }
   0x6   :  { %1927 = vmatprep.subr.bf16.mxu1 %v2090_v6  ;;  %v2097_v13 = vld [vmem:[%s2742_s1 + $0x18] sm:$0xff]   ;;  %v2101_v17 = vld [vmem:[%s2742_s1 + $0x20] sm:$0xff]   ;;  %v2105_v21 = vld [vmem:[%s2742_s1 + $0x28] sm:$0xff]  }
   0x7   :  { %1906 = vmatpush3.bf16.msra.mxu0 %v2089_v5  ;;  %v2098_v14 = vld [vmem:[%s2742_s1 + $0xd8] sm:$0xff]   ;;  %v2102_v18 = vld [vmem:[%s2742_s1 + $0xe0] sm:$0xff]   ;;  %v2106_v22 = vld [vmem:[%s2742_s1 + $0xe8] sm:$0xff]  }
   0x8   :  { %1907 = vmatprep.subr.bf16.mxu0 %v2092_v8  ;;  %v2099_v15 = vld [vmem:[%s2742_s1 + $0x98] sm:$0xff]   ;;  %v2103_v19 = vld [vmem:[%s2742_s1 + $0xa0] sm:$0xff]   ;;  %v2107_v23 = vld [vmem:[%s2742_s1 + $0xa8] sm:$0xff]  }
   0x9   :  { %1928 = vmatpush3.bf16.msra.mxu1 %v2091_v7  ;;  %v2108_v24 = vld [vmem:[%s2742_s1 + $0x70] sm:$0xff]   ;;  %v2112_v28 = vld [vmem:[%s2742_s1 + $0x78] sm:$0xff]   ;;  %v2121_v36 = vld [vmem:[%s2743_s0 + $0xc] ss:$20 sps:$4 sm:$0xff]  }
   0xa   :  { %1929 = vmatprep.subr.bf16.mxu1 %v2094_v10  ;;  %v2109_v25 = vld [vmem:[%s2742_s1 + $0x30] sm:$0xff]   ;;  %v2113_v29 = vld [vmem:[%s2742_s1 + $0x38] sm:$0xff]   ;;  %v2122_v37 = vld [vmem:[%s2742_s1 + $0x100] sm:$0xff]   ;;  %436 = vmatprep.mubr.bf16.mxu1 %v2121_v36 }
   0xb   :  { %1908 = vmatpush3.bf16.msra.mxu0 %v2093_v9  ;;  %v2110_v26 = vld [vmem:[%s2742_s1 + $0xf0] sm:$0xff]   ;;  %v2114_v30 = vld [vmem:[%s2742_s1 + $0xf8] sm:$0xff]   ;;  %v2123_v38 = vld [vmem:[%s2742_s1 + $0x108] sm:$0xff]  }
   0xc   :  { %1909 = vmatprep.subr.bf16.mxu0 %v2096_v12  ;;  %v2111_v27 = vld [vmem:[%s2742_s1 + $0xb0] sm:$0xff]   ;;  %v2117_v32 = vld [vmem:[%s2743_s0 + $0x4] ss:$20 sps:$4 sm:$0xff]   ;;  %v2119_v35 = vld [vmem:[%s2743_s0 + $0x8] ss:$20 sps:$4 sm:$0xff]  }
   0xd   :  { %1930 = vmatpush3.bf16.msra.mxu1 %v2095_v11  ;;  %v2115_v31 = vld [vmem:[%s2743_s0] ss:$20 sps:$4 sm:$0xff]   ;;  %v2118_v34 = vld [vmem:[%s2742_s1 + $0xb8] sm:$0xff]   ;;  %395 = vmatprep.mubr.bf16.mxu0 %v2117_v32  ;;  %v2126_v41 = vld [vmem:[%s2743_s0 + $0x10] ss:$20 sps:$4 sm:$0xff]  }
   0xe   :  { %1931 = vmatprep.subr.bf16.mxu1 %v2098_v14  ;;  %v2124_v39 = vld [vmem:[%s2742_s1 + $0x110] sm:$0xff]   ;;  %v2125_v40 = vld [vmem:[%s2742_s1 + $0x118] sm:$0xff]   ;;  %v489_v42 = vld [vmem:[%s2744_s3] sm:$0xff] }
   0xf   :  { %1910 = vmatpush3.bf16.msra.mxu0 %v2097_v13  ;;  %v493_v43 = vld [vmem:[%s2744_s3 + $0x20] sm:$0xff]  ;;  %v490_v44 = vld [vmem:[%s2744_s3 + $0x8] sm:$0xff]  ;;  %v491_v10 = vld [vmem:[%s2744_s3 + $0x10] sm:$0xff] }
  0x10   :  { %1911 = vmatprep.subr.bf16.mxu0 %v2100_v16  ;;  %v1793_v45 = vcombine.low %v489_v42, %v493_v43  ;;  %v1794_v46 = vcombine.high %v489_v42, %v493_v43  ;;  %v494_v47 = vld [vmem:[%s2744_s3 + $0x28] sm:$0xff]  ;;  %v497_v48 = vld [vmem:[%s2744_s3 + $0x40] sm:$0xff]  ;;  %v495_v11 = vld [vmem:[%s2744_s3 + $0x30] sm:$0xff] }
  0x11   :  { %1932 = vmatpush3.bf16.msra.mxu1 %v2099_v15  ;;  %v501_v49 = vld [vmem:[%s2744_s3 + $0x60] sm:$0xff]  ;;  %v1795_v50 = vcombine.low %v490_v44, %v494_v47  ;;  %v1796_v51 = vcombine.high %v490_v44, %v494_v47  ;;  %v498_v53 = vld [vmem:[%s2744_s3 + $0x48] sm:$0xff]  ;;  %v492_v12 = vld [vmem:[%s2744_s3 + $0x18] sm:$0xff]  ;;  %v1798_v13 = vcombine.high %v491_v10, %v495_v11  ;;  %v1797_v15 = vcombine.low %v491_v10, %v495_v11 }
  0x12   :  { %1933 = vmatprep.subr.bf16.mxu1 %v2102_v18  ;;  %v1802_v52 = vcombine.high %v497_v48, %v501_v49  ;;  %v502_v54 = vld [vmem:[%s2744_s3 + $0x68] sm:$0xff]  ;;  %v1801_v56 = vcombine.low %v497_v48, %v501_v49  ;;  %v505_v58 = vld [vmem:[%s2744_s3 + $0x80] sm:$0xff]  ;;  %v496_v14 = vld [vmem:[%s2744_s3 + $0x38] sm:$0xff]  ;;  %v2201_v18 = vmov 0  }
  0x13   :  { %1912 = vmatpush3.bf16.msra.mxu0 %v2101_v17  ;;  %v1804_v55 = vcombine.high %v498_v53, %v502_v54  ;;  %v1803_v57 = vcombine.low %v498_v53, %v502_v54  ;;  %v509_v59 = vld [vmem:[%s2744_s3 + $0xa0] sm:$0xff]  ;;  %v506_v60 = vld [vmem:[%s2744_s3 + $0x88] sm:$0xff]  ;;  %v1799_v16 = vcombine.low %v492_v12, %v496_v14  ;;  %v1800_v17 = vcombine.high %v492_v12, %v496_v14  ;;  %v499_v43 = vld [vmem:[%s2744_s3 + $0x50] sm:$0xff] }
  0x14   :  { %1913 = vmatprep.subr.bf16.mxu0 %v2104_v20  ;;  %v1810_v61 = vcombine.high %v505_v58, %v509_v59  ;;  %v510_v62 = vld [vmem:[%s2744_s3 + $0xa8] sm:$0xff]  ;;  %v1809_v63 = vcombine.low %v505_v58, %v509_v59  ;;  %v513_v2 = vld [vmem:[%s2744_s3 + $0xc0] sm:$0xff]  ;;  %v503_v44 = vld [vmem:[%s2744_s3 + $0x70] sm:$0xff] }
  0x15   :  { %1934 = vmatpush3.bf16.msra.mxu1 %v2103_v19  ;;  %v1811_v0 = vcombine.low %v506_v60, %v510_v62  ;;  %v1812_v1 = vcombine.high %v506_v60, %v510_v62  ;;  %v517_v3 = vld [vmem:[%s2744_s3 + $0xe0] sm:$0xff]  ;;  %v514_v4 = vld [vmem:[%s2744_s3 + $0xc8] sm:$0xff]  ;;  %v511_v53 = vld [vmem:[%s2744_s3 + $0xb0] sm:$0xff] }
  0x16   :  { %1935 = vmatprep.subr.bf16.mxu1 %v2106_v22  ;;  %v1818_v5 = vcombine.high %v513_v2, %v517_v3  ;;  %v518_v6 = vld [vmem:[%s2744_s3 + $0xe8] sm:$0xff]  ;;  %v1817_v7 = vcombine.low %v513_v2, %v517_v3  ;;  %v1750_v20 = vld [vmem:[%s2746_s2] ss:$0 sm:$0xff]  ;;  %v508_v54 = vld [vmem:[%s2744_s3 + $0x98] sm:$0xff] }
  0x17   :  { %1914 = vmatpush3.bf16.msra.mxu0 %v2105_v21  ;;  %v1819_v8 = vcombine.low %v514_v4, %v518_v6  ;;  %v1820_v9 = vcombine.high %v514_v4, %v518_v6  ;;  %v515_v60 = vld [vmem:[%s2744_s3 + $0xd0] sm:$0xff]  ;;  %v516_v62 = vld [vmem:[%s2744_s3 + $0xd8] sm:$0xff]  ;;  %v2127_v6 = vld [vmem:[%s2745_s5 + $0x40] sm:$0xff]  }
  0x18   :  { %1915 = vmatprep.subr.bf16.mxu0 %v2108_v24  ;;  %v2131_v10 = vld [vmem:[%s2745_s5 + $0x48] sm:$0xff]   ;;  %v2135_v14 = vld [vmem:[%s2745_s5 + $0x50] sm:$0xff]  }
  0x19   :  { %1936 = vmatpush3.bf16.msra.mxu1 %v2107_v23  ;;  %v2132_v11 = vld [vmem:[%s2745_s5 + $0xc8] sm:$0xff]  }
  0x1a   :  { %1937 = vmatprep.subr.bf16.mxu1 %v2110_v26  ;;  %v2133_v12 = vld [vmem:[%s2745_s5 + $0x8] sm:$0xff]  }
  0x1b   :  { %1916 = vmatpush3.bf16.msra.mxu0 %v2109_v25 }
  0x1c   :  { %1917 = vmatprep.subr.bf16.mxu0 %v2112_v28 }
  0x1d   :  { %1938 = vmatpush3.bf16.msra.mxu1 %v2111_v27 }
  0x1e   :  { %1939 = vmatprep.subr.bf16.mxu1 %v2114_v30 }
  0x1f   :  { %1918 = vmatpush3.bf16.msra.mxu0 %v2113_v29 }
  0x20   :  { %2049 = vmatprep.subr.bf16.mxu0 %v2199_v33 }
  0x21   :  { %1940 = vmatpush3.bf16.msra.mxu1 %v2118_v34 }
  0x22   :  { %396 = vmatmul.mubr.bf16.vlgmr.msra.gmra.mrb[0].mxu0 %v2115_v31  ;;  %726 = vmatprep.subr.bf16.mxu1 %v1794_v46  ;;  %v504_v46 = vld [vmem:[%s2744_s3 + $0x78] sm:$0xff] }
  0x23   :  { %2057 = vmatprep.mubr.msk.bf16.mxu0 %vm2200_vm0, %v2199_v33  ;;  %2050 = vmatpush3.bf16.msra.mxu0 %v2122_v37 }
  0x24   :  { %437 = vmatmul.mubr.bf16.vlgmr.msra.gmra.mrb[0].mxu1 %v2119_v35  ;;  %2051 = vmatprep.subr.bf16.mxu0 %v2199_v33 }
  0x25   :  { %727 = vmatpush1.bf16.msra.mxu1 %v1793_v45  ;;  %758 = vmatprep.mubr.bf16.mxu1 %v2201_v18  ;;  %v500_v45 = vld [vmem:[%s2744_s3 + $0x58] sm:$0xff] }
  0x26   :  { %728 = vmatprep.subr.bf16.mxu1 %v1802_v52  ;;  %v507_v52 = vld [vmem:[%s2744_s3 + $0x90] sm:$0xff] }
  0x27   :  { %2052 = vmatpush3.bf16.msra.mxu0 %v2123_v38  ;;  %v1814_v58 = vcombine.high %v507_v52, %v511_v53 }
  0x28   :  { %2053 = vmatprep.subr.bf16.mxu0 %v2199_v33 }
  0x29   :  { %729 = vmatpush1.bf16.msra.mxu1 %v1801_v56  ;;  %v1805_v56 = vcombine.low %v499_v43, %v503_v44 }
  0x2a   :  { %730 = vmatprep.subr.bf16.mxu1 %v1810_v61  ;;  %v519_v61 = vld [vmem:[%s2744_s3 + $0xf0] sm:$0xff] }
  0x2b   :  { %2054 = vmatpush3.bf16.msra.mxu0 %v2124_v39  ;;  %v1822_v2 = vcombine.high %v515_v60, %v519_v61  ;;  %v1821_v4 = vcombine.low %v515_v60, %v519_v61 }
  0x2c   :  { %2055 = vmatprep.subr.bf16.mxu0 %v2199_v33 }
  0x2d   :  { %731 = vmatpush1.bf16.msra.mxu1 %v1809_v63  ;;  %v520_v63 = vld [vmem:[%s2744_s3 + $0xf8] sm:$0xff] }
  0x2e   :  { %732 = vmatprep.subr.bf16.mxu1 %v1818_v5  ;;  %v1824_v3 = vcombine.high %v516_v62, %v520_v63  ;;  %v1823_v5 = vcombine.low %v516_v62, %v520_v63 }
  0x2f   :  { %2056 = vmatpush3.bf16.msra.mxu0 %v2125_v40 }
  0x30   :  { %769 = vmatprep.subr.bf16.mxu0 %v1796_v51  ;;  %v1808_v51 = vcombine.high %v500_v45, %v504_v46 }
  0x31   :  { %733 = vmatpush1.bf16.msra.mxu1 %v1817_v7  ;;  %v2128_v7 = vld [vmem:[%s2745_s5 + $0xc0] sm:$0xff]  }
  0x32   :  { %2058 = vmatmul.mubr.msk.bf16.vlgmr.msra.gmra.mrb[4].mxu0 %vm359_vm1, %v2126_v41  ;;  %812 = vmatprep.subr.bf16.mxu1 %v1798_v13  ;;  %v2134_v13 = vld [vmem:[%s2745_s5 + $0x88] sm:$0xff]  }
  0x33   :  { %770 = vmatpush1.bf16.msra.mxu0 %v1795_v50  ;;  %801 = vmatprep.mubr.bf16.mxu0 %v2201_v18  ;;  %v1806_v50 = vcombine.high %v499_v43, %v503_v44 }
  0x34   :  { %771 = vmatprep.subr.bf16.mxu0 %v1804_v55  ;;  %v512_v55 = vld [vmem:[%s2744_s3 + $0xb8] sm:$0xff] }
  0x35   :  { %v1816_v59 = vcombine.high %v508_v54, %v512_v55 }
  0x37   :  { %772 = vmatpush1.bf16.msra.mxu0 %v1803_v57  ;;  %v1807_v57 = vcombine.low %v500_v45, %v504_v46  ;;  %v521_v45 = vld [vmem:[%s2747_s4] sm:$0xff] }
  0x38   :  { %773 = vmatprep.subr.bf16.mxu0 %v1812_v1  ;;  %v1815_v1 = vcombine.low %v508_v54, %v512_v55 }
  0x3b   :  { %774 = vmatpush1.bf16.msra.mxu0 %v1811_v0  ;;  %v1813_v0 = vcombine.low %v507_v52, %v511_v53 }
  0x3c   :  { %775 = vmatprep.subr.bf16.mxu0 %v1820_v9  ;;  %v2130_v9 = vld [vmem:[%s2745_s5 + $0x80] sm:$0xff]  }
  0x3f   :  { %776 = vmatpush1.bf16.msra.mxu0 %v1819_v8  ;;  %v2129_v8 = vld [vmem:[%s2745_s5] sm:$0xff]  }
  0x40   :  { %855 = vmatprep.subr.bf16.mxu0 %v1800_v17  ;;  %v2138_v17 = vld [vmem:[%s2745_s5 + $0x90] sm:$0xff]  }
  0xf5   :  { %v1919_v19 = vpop.f32.mrb[0].mxu0 }
  0xf6   :  { %v1920_v21 = vpop.f32.mrb[1].mxu0 }
  0xf7   :  { %v1921_v22 = vadd.f32 %v1920_v21, %v1919_v19  ;;  %v1922_v23 = vpop.f32.mrb[2].mxu0  ;;  %v1941_v24 = vpop.f32.mrb[0].mxu1  ;;  %v2140_v19 = vld [vmem:[%s2745_s5 + $0xd8] sm:$0xff]  }
  0xf8   :  { %v1923_v25 = vpop.f32.mrb[3].mxu0  ;;  %v1942_v28 = vpop.f32.mrb[1].mxu1  ;;  %v2142_v21 = vld [vmem:[%s2745_s5 + $0x98] sm:$0xff]  }
  0xf9   :  { %v398_v26 = vadd.f32 %v1921_v22, %v1750_v20  ;;  %v1924_v27 = vadd.f32 %v1923_v25, %v1922_v23  ;;  %v1943_v29 = vadd.f32 %v1942_v28, %v1941_v24  ;;  %v1944_v30 = vpop.f32.mrb[2].mxu1  ;;  %v2143_v22 = vld [vmem:[%s2745_s5 + $0x60] sm:$0xff]   ;;  %v2149_v28 = vld [vmem:[%s2745_s5 + $0x28] sm:$0xff]  }
  0xfa   :  { %v1945_v32 = vpop.f32.mrb[3].mxu1  ;;  %v2144_v23 = vld [vmem:[%s2745_s5 + $0xe0] sm:$0xff]  }
  0xfb   :  { %v401_v31 = vadd.f32 %v1924_v27, %v1750_v20  ;;  %v1946_v34 = vadd.f32 %v1945_v32, %v1944_v30  ;;  %v439_v35 = vadd.f32 %v1943_v29, %v398_v26  ;;  %v2141_v20 = vld [vmem:[%s2745_s5 + $0x18] sm:$0xff]   ;;  %v2145_v24 = vld [vmem:[%s2745_s5 + $0x20] sm:$0xff]   ;;  %v2147_v26 = vld [vmem:[%s2745_s5 + $0x68] sm:$0xff]  }
  0xfc   :  { %v2146_v25 = vld [vmem:[%s2745_s5 + $0xa0] sm:$0xff]   ;;  %v2148_v27 = vld [vmem:[%s2745_s5 + $0xe8] sm:$0xff]   ;;  %v2151_v30 = vld [vmem:[%s2745_s5 + $0x70] sm:$0xff]  }
  0xfd   :  { %v442_v36 = vadd.f32 %v1946_v34, %v401_v31  ;;  %v2150_v29 = vld [vmem:[%s2745_s5 + $0xa8] sm:$0xff]   ;;  %v2152_v31 = vld [vmem:[%s2745_s5 + $0xf0] sm:$0xff]  }
  0xfe   :  { %v2153_v32 = vld [vmem:[%s2745_s5 + $0x30] sm:$0xff]  }
  0xff   :  { %v2154_v34 = vld [vmem:[%s2745_s5 + $0xb0] sm:$0xff]  }
 0x105   :  { %v479_v37 = vpop.f32.mrb[4].mxu0 }
 0x106   :  { %v480_v38 = vadd.f32 %v479_v37, %v439_v35  ;;  %v2059_v39 = vpop.f32.mrb[5].mxu0  ;;  %v2155_v35 = vld [vmem:[%s2745_s5 + $0x78] sm:$0xff]  }
 0x107   :  { %v482_v40 = vpop.f32.mrb[6].mxu0  ;;  %v2157_v37 = vld [vmem:[%s2745_s5 + $0x38] sm:$0xff]   ;;  %v2159_v39 = vld [vmem:[%s2745_s5 + $0x140] sm:$0xff]  }
 0x108   :  { %v483_v41 = vadd.f32 %v482_v40, %v442_v36  ;;  %v2060_v42 = vpop.f32.mrb[7].mxu0  ;;  %v486_v47 = vmax.f32 %v480_v38, 0.0  ;;  %v2156_v36 = vld [vmem:[%s2745_s5 + $0xf8] sm:$0xff]   ;;  %v2160_v40 = vld [vmem:[%s2745_s5 + $0x1c0] sm:$0xff]  }
 0x109   :  { %v2158_v38 = vld [vmem:[%s2745_s5 + $0xb8] sm:$0xff]  }
 0x10a   :  { %v487_v48 = vmax.f32 %v483_v41, 0.0  ;;  %v523_v41 = vlaneseq }
 0x10c   :  { %v488_v49 = vpack.c.bf16 %v487_v48, %v486_v47  ;;  %v2588_v42 = vshrl.u32 %v523_v41, 7 }
 0x10e   :  { %1825 = vmatmul.mubr.msk.bf16.vlgmr.msra.gmra.mrb[4].mxu1 %vm359_vm1, %v488_v49  ;;  %1826 = vmatmul.mubr.msk.bf16.vlgmr.msra.gmra.mrb[8].mxu0 %vm359_vm1, %v488_v49  ;;  %v525_v43 = vsub.s32 0, %v2588_v42  ;;  %v533_v44 = vsub.s32 2, %v2588_v42  ;;  %v529_v46 = vsub.s32 1, %v2588_v42  ;;  %v537_v47 = vsub.s32 3, %v2588_v42 }
 0x10f   :  { %813 = vmatpush1.bf16.msra.mxu1 %v1797_v15  ;;  %856 = vmatpush1.bf16.msra.mxu0 %v1799_v16  ;;  %v2136_v15 = vld [vmem:[%s2745_s5 + $0xd0] sm:$0xff]  }
 0x110   :  { %814 = vmatprep.subr.bf16.mxu1 %v1806_v50  ;;  %857 = vmatprep.subr.bf16.mxu0 %v1808_v51  ;;  %v2137_v16 = vld [vmem:[%s2745_s5 + $0x10] sm:$0xff]   ;;  %v526_v48 = vrot.slane %v521_v45, %v525_v43  ;;  %v530_v50 = vrot.slane %v521_v45, %v529_v46  ;;  %v538_v51 = vrot.slane %v521_v45, %v537_v47  ;;  %v2172_v43 = vld [vmem:[%s2745_s5 + $0x1d8] sm:$0xff]  }
 0x111   :  { %844 = vmatprep.mubr.bf16.mxu1 %v2201_v18  ;;  %887 = vmatprep.mubr.bf16.mxu0 %v2201_v18  ;;  %v2139_v18 = vld [vmem:[%s2745_s5 + $0x58] sm:$0xff]  }
 0x113   :  { %815 = vmatpush1.bf16.msra.mxu1 %v1805_v56  ;;  %858 = vmatpush1.bf16.msra.mxu0 %v1807_v57 }
 0x114   :  { %816 = vmatprep.subr.bf16.mxu1 %v1814_v58  ;;  %859 = vmatprep.subr.bf16.mxu0 %v1816_v59 }
 0x117   :  { %817 = vmatpush1.bf16.msra.mxu1 %v1813_v0  ;;  %860 = vmatpush1.bf16.msra.mxu0 %v1815_v1 }
 0x118   :  { %818 = vmatprep.subr.bf16.mxu1 %v1822_v2  ;;  %861 = vmatprep.subr.bf16.mxu0 %v1824_v3 }
 0x11b   :  { %819 = vmatpush1.bf16.msra.mxu1 %v1821_v4  ;;  %862 = vmatpush1.bf16.msra.mxu0 %v1823_v5 }
 0x11c   :  { %1952 = vmatprep.subr.bf16.mxu1 %v2127_v6  ;;  %1974 = vmatprep.subr.bf16.mxu0 %v2128_v7 }
 0x11e   :  { %1827 = vmatmul.mubr.msk.bf16.vlgmr.msra.gmra.mrb[8].mxu1 %vm359_vm1, %v488_v49  ;;  %1828 = vmatmul.mubr.msk.bf16.vlgmr.msra.gmra.mrb[12].mxu0 %vm359_vm1, %v488_v49  ;;  %v534_v49 = vrot.slane %v521_v45, %v533_v44 }
 0x11f   :  { %1953 = vmatpush3.bf16.msra.mxu1 %v2129_v8  ;;  %1975 = vmatpush3.bf16.msra.mxu0 %v2130_v9 }
 0x120   :  { %1954 = vmatprep.subr.bf16.mxu1 %v2131_v10  ;;  %1976 = vmatprep.subr.bf16.mxu0 %v2132_v11 }
 0x123   :  { %1955 = vmatpush3.bf16.msra.mxu1 %v2133_v12  ;;  %1977 = vmatpush3.bf16.msra.mxu0 %v2134_v13 }
 0x124   :  { %1956 = vmatprep.subr.bf16.mxu1 %v2135_v14  ;;  %1978 = vmatprep.subr.bf16.mxu0 %v2136_v15 }
 0x127   :  { %1957 = vmatpush3.bf16.msra.mxu1 %v2137_v16  ;;  %1979 = vmatpush3.bf16.msra.mxu0 %v2138_v17  ;;  %v2161_v16 = vld [vmem:[%s2745_s5 + $0x100] sm:$0xff]  }
 0x128   :  { %1958 = vmatprep.subr.bf16.mxu1 %v2139_v18  ;;  %1980 = vmatprep.subr.bf16.mxu0 %v2140_v19  ;;  %v2162_v17 = vld [vmem:[%s2745_s5 + $0x180] sm:$0xff]   ;;  %v2163_v18 = vld [vmem:[%s2745_s5 + $0x148] sm:$0xff]  }
 0x129   :  { %v2164_v19 = vld [vmem:[%s2745_s5 + $0x1c8] sm:$0xff]  }
 0x12b   :  { %1959 = vmatpush3.bf16.msra.mxu1 %v2141_v20  ;;  %1981 = vmatpush3.bf16.msra.mxu0 %v2142_v21  ;;  %v541_v20 = vsub.s32 4, %v2588_v42  ;;  %v549_v21 = vsub.s32 6, %v2588_v42 }
 0x12c   :  { %1960 = vmatprep.subr.bf16.mxu1 %v2143_v22  ;;  %1982 = vmatprep.subr.bf16.mxu0 %v2144_v23  ;;  %v545_v22 = vsub.s32 5, %v2588_v42  ;;  %v553_v23 = vsub.s32 7, %v2588_v42  ;;  %v2171_v42 = vld [vmem:[%s2745_s5 + $0x158] sm:$0xff]  }
 0x12f   :  { %1961 = vmatpush3.bf16.msra.mxu1 %v2145_v24  ;;  %1983 = vmatpush3.bf16.msra.mxu0 %v2146_v25  ;;  %v2165_v24 = vld [vmem:[%s2745_s5 + $0x108] sm:$0xff]  }
 0x130   :  { %1962 = vmatprep.subr.bf16.mxu1 %v2147_v26  ;;  %1984 = vmatprep.subr.bf16.mxu0 %v2148_v27  ;;  %v2166_v25 = vld [vmem:[%s2745_s5 + $0x188] sm:$0xff]   ;;  %v542_v26 = vrot.slane %v521_v45, %v541_v20  ;;  %v550_v27 = vrot.slane %v521_v45, %v549_v21  ;;  %v2191_v20 = vld [vmem:[%s2748_s7] sm:$0xff]  }
 0x131   :  { %v2192_v21 = vld [vmem:[%s2748_s7 + $0x8] sm:$0xff]  }
 0x133   :  { %1963 = vmatpush3.bf16.msra.mxu1 %v2149_v28  ;;  %1985 = vmatpush3.bf16.msra.mxu0 %v2150_v29  ;;  %v2167_v28 = vld [vmem:[%s2745_s5 + $0x150] sm:$0xff]  }
 0x134   :  { %1964 = vmatprep.subr.bf16.mxu1 %v2151_v30  ;;  %1986 = vmatprep.subr.bf16.mxu0 %v2152_v31  ;;  %v2168_v29 = vld [vmem:[%s2745_s5 + $0x1d0] sm:$0xff]   ;;  %v546_v30 = vrot.slane %v521_v45, %v545_v22  ;;  %v554_v31 = vrot.slane %v521_v45, %v553_v23  ;;  %v2194_v23 = vld [vmem:[%s2748_s7 + $0x18] sm:$0xff]  }
 0x135   :  { %v2193_v22 = vld [vmem:[%s2748_s7 + $0x10] sm:$0xff]  }
 0x137   :  { %1965 = vmatpush3.bf16.msra.mxu1 %v2153_v32  ;;  %1987 = vmatpush3.bf16.msra.mxu0 %v2154_v34 }
 0x138   :  { %1966 = vmatprep.subr.bf16.mxu1 %v2155_v35  ;;  %1988 = vmatprep.subr.bf16.mxu0 %v2156_v36  ;;  %v2169_v35 = vld [vmem:[%s2745_s5 + $0x110] sm:$0xff]  }
 0x139   :  { %v2170_v36 = vld [vmem:[%s2745_s5 + $0x190] sm:$0xff]  }
 0x13b   :  { %1967 = vmatpush3.bf16.msra.mxu1 %v2157_v37  ;;  %1989 = vmatpush3.bf16.msra.mxu0 %v2158_v38 }
 0x13c   :  { %1996 = vmatprep.subr.bf16.mxu1 %v2159_v39  ;;  %2018 = vmatprep.subr.bf16.mxu0 %v2160_v40 }
 0x1e1   :  { %v760_v52 = vpop.f32.mrb[4].mxu1  ;;  %v803_v53 = vpop.f32.mrb[8].mxu0 }
 0x1e2   :  { %v761_v54 = vadd.f32 %v760_v52, %v526_v48  ;;  %v804_v55 = vadd.f32 %v803_v53, %v534_v49  ;;  %v762_v56 = vpop.f32.mrb[5].mxu1  ;;  %v805_v57 = vpop.f32.mrb[9].mxu0 }
 0x1e3   :  { %v763_v58 = vadd.f32 %v762_v56, %v530_v50  ;;  %v806_v59 = vadd.f32 %v805_v57, %v538_v51  ;;  %v764_v60 = vpop.f32.mrb[6].mxu1  ;;  %v807_v61 = vpop.f32.mrb[10].mxu0 }
 0x1e4   :  { %v765_v62 = vadd.f32 %v764_v60, %v526_v48  ;;  %v808_v63 = vadd.f32 %v807_v61, %v534_v49  ;;  %v766_v0 = vpop.f32.mrb[7].mxu1  ;;  %v809_v1 = vpop.f32.mrb[11].mxu0  ;;  %v898_v4 = vmax.f32 %v761_v54, 0.0  ;;  %v900_v5 = vmax.f32 %v804_v55, 0.0  ;;  %v2173_v54 = vld [vmem:[%s2745_s5 + $0x118] sm:$0xff]   ;;  %v2175_v60 = vld [vmem:[%s2745_s5 + $0x160] sm:$0xff]  }
 0x1e5   :  { %v767_v2 = vadd.f32 %v766_v0, %v530_v50  ;;  %v810_v3 = vadd.f32 %v809_v1, %v538_v51  ;;  %v899_v8 = vmax.f32 %v763_v58, 0.0  ;;  %v901_v9 = vmax.f32 %v806_v59, 0.0  ;;  %v2174_v55 = vld [vmem:[%s2745_s5 + $0x198] sm:$0xff]   ;;  %v2176_v61 = vld [vmem:[%s2745_s5 + $0x1e0] sm:$0xff]  }
 0x1e6   :  { %v906_v6 = vmax.f32 %v765_v62, 0.0  ;;  %v908_v7 = vmax.f32 %v808_v63, 0.0 }
 0x1e7   :  { %v907_v10 = vmax.f32 %v767_v2, 0.0  ;;  %v909_v11 = vmax.f32 %v810_v3, 0.0 }
 0x1e8   :  { %v914_v12 = vpack.c.bf16 %v906_v6, %v898_v4  ;;  %v916_v13 = vpack.c.bf16 %v908_v7, %v900_v5  ;;  %v2177_v6 = vld [vmem:[%s2745_s5 + $0x120] sm:$0xff]  }
 0x1e9   :  { %v915_v14 = vpack.c.bf16 %v907_v10, %v899_v8  ;;  %v917_v15 = vpack.c.bf16 %v909_v11, %v901_v9  ;;  %v2178_v7 = vld [vmem:[%s2745_s5 + $0x1a0] sm:$0xff]   ;;  %v2179_v8 = vld [vmem:[%s2745_s5 + $0x168] sm:$0xff]  }
 0x1ea   :  { %v2180_v9 = vld [vmem:[%s2745_s5 + $0x1e8] sm:$0xff]  }
 0x1eb   :  { %1473 = vmatprep.mubr.bf16.mxu1 %v915_v14  ;;  %1514 = vmatprep.mubr.bf16.mxu0 %v917_v15  ;;  %v2181_v10 = vld [vmem:[%s2745_s5 + $0x128] sm:$0xff]   ;;  %v2185_v14 = vld [vmem:[%s2745_s5 + $0x130] sm:$0xff]  }
 0x1ec   :  { %1474 = vmatmul.mubr.bf16.vlgmr.msra.gmra.mrb[12].mxu1 %v914_v12  ;;  %1515 = vmatmul.mubr.bf16.vlgmr.msra.gmra.mrb[16].mxu0 %v916_v13  ;;  %v2182_v11 = vld [vmem:[%s2745_s5 + $0x1a8] sm:$0xff]   ;;  %v2183_v12 = vld [vmem:[%s2745_s5 + $0x170] sm:$0xff]  }
 0x1ed   :  { %1997 = vmatpush3.bf16.msra.mxu1 %v2161_v16  ;;  %2019 = vmatpush3.bf16.msra.mxu0 %v2162_v17  ;;  %v2184_v13 = vld [vmem:[%s2745_s5 + $0x1f0] sm:$0xff]   ;;  %v2187_v16 = vld [vmem:[%s2745_s5 + $0x178] sm:$0xff]  }
 0x1ee   :  { %1998 = vmatprep.subr.bf16.mxu1 %v2163_v18  ;;  %2020 = vmatprep.subr.bf16.mxu0 %v2164_v19  ;;  %v2186_v15 = vld [vmem:[%s2745_s5 + $0x1b0] sm:$0xff]   ;;  %v2188_v17 = vld [vmem:[%s2745_s5 + $0x1f8] sm:$0xff]  }
 0x1ef   :  { %v2189_v18 = vld [vmem:[%s2745_s5 + $0x138] sm:$0xff]  }
 0x1f0   :  { %v2190_v19 = vld [vmem:[%s2745_s5 + $0x1b8] sm:$0xff]  }
 0x1f1   :  { %v846_v32 = vpop.f32.mrb[8].mxu1  ;;  %v889_v34 = vpop.f32.mrb[12].mxu0  ;;  %1999 = vmatpush3.bf16.msra.mxu1 %v2165_v24  ;;  %2021 = vmatpush3.bf16.msra.mxu0 %v2166_v25  ;;  %v2195_v24 = vld [vmem:[%s2748_s7 + $0x20] sm:$0xff]   ;;  %v2196_v25 = vld [vmem:[%s2748_s7 + $0x28] sm:$0xff]  }
 0x1f2   :  { %v847_v37 = vadd.f32 %v846_v32, %v542_v26  ;;  %v890_v38 = vadd.f32 %v889_v34, %v550_v27  ;;  %v848_v39 = vpop.f32.mrb[9].mxu1  ;;  %v891_v40 = vpop.f32.mrb[13].mxu0  ;;  %2000 = vmatprep.subr.bf16.mxu1 %v2167_v28  ;;  %2022 = vmatprep.subr.bf16.mxu0 %v2168_v29 }
 0x1f3   :  { %v849_v44 = vadd.f32 %v848_v39, %v546_v30  ;;  %v892_v45 = vadd.f32 %v891_v40, %v554_v31  ;;  %v850_v46 = vpop.f32.mrb[10].mxu1  ;;  %v893_v47 = vpop.f32.mrb[14].mxu0 }
 0x1f4   :  { %v851_v48 = vadd.f32 %v850_v46, %v542_v26  ;;  %v894_v49 = vadd.f32 %v893_v47, %v550_v27  ;;  %v852_v50 = vpop.f32.mrb[11].mxu1  ;;  %v895_v51 = vpop.f32.mrb[15].mxu0  ;;  %v902_v56 = vmax.f32 %v847_v37, 0.0  ;;  %v904_v57 = vmax.f32 %v890_v38, 0.0  ;;  %v2197_v26 = vld [vmem:[%s2748_s7 + $0x30] sm:$0xff]   ;;  %v2198_v27 = vld [vmem:[%s2748_s7 + $0x38] sm:$0xff]  }
 0x1f5   :  { %v853_v52 = vadd.f32 %v852_v50, %v546_v30  ;;  %v896_v53 = vadd.f32 %v895_v51, %v554_v31  ;;  %2001 = vmatpush3.bf16.msra.mxu1 %v2169_v35  ;;  %2023 = vmatpush3.bf16.msra.mxu0 %v2170_v36  ;;  %v903_v62 = vmax.f32 %v849_v44, 0.0  ;;  %v905_v63 = vmax.f32 %v892_v45, 0.0  ;;  %v1829_v30 = vld [vmem:[%s2749_s6] ss:$0 sm:$0xff] }
 0x1f6   :  { %v910_v58 = vmax.f32 %v851_v48, 0.0  ;;  %v912_v59 = vmax.f32 %v894_v49, 0.0  ;;  %2002 = vmatprep.subr.bf16.mxu1 %v2171_v42  ;;  %2024 = vmatprep.subr.bf16.mxu0 %v2172_v43 }
 0x1f7   :  { %v911_v0 = vmax.f32 %v853_v52, 0.0  ;;  %v913_v1 = vmax.f32 %v896_v53, 0.0 }
 0x1f8   :  { %v918_v2 = vpack.c.bf16 %v910_v58, %v902_v56  ;;  %v920_v3 = vpack.c.bf16 %v912_v59, %v904_v57 }
 0x1f9   :  { %v919_v4 = vpack.c.bf16 %v911_v0, %v903_v62  ;;  %v921_v5 = vpack.c.bf16 %v913_v1, %v905_v63  ;;  %2003 = vmatpush3.bf16.msra.mxu1 %v2173_v54  ;;  %2025 = vmatpush3.bf16.msra.mxu0 %v2174_v55  ;;  %v1721_v1 = vand.u32 127, %v523_v41 }
 0x1fa   :  { %2004 = vmatprep.subr.bf16.mxu1 %v2175_v60  ;;  %2026 = vmatprep.subr.bf16.mxu0 %v2176_v61 }
 0x1fb   :  { %1555 = vmatprep.mubr.bf16.mxu1 %v919_v4  ;;  %1596 = vmatprep.mubr.bf16.mxu0 %v921_v5  ;;  %vm1731_vm2 = vcmp.eq.s32.totalorder %v1721_v1, 6  ;;  %vm1722_vm3 = vcmp.lt.s32.totalorder %v1721_v1, 6 }
 0x1fd   :  { %2005 = vmatpush3.bf16.msra.mxu1 %v2177_v6  ;;  %2027 = vmatpush3.bf16.msra.mxu0 %v2178_v7 }
 0x1fe   :  { %2006 = vmatprep.subr.bf16.mxu1 %v2179_v8  ;;  %2028 = vmatprep.subr.bf16.mxu0 %v2180_v9 }
 0x201   :  { %2007 = vmatpush3.bf16.msra.mxu1 %v2181_v10  ;;  %2029 = vmatpush3.bf16.msra.mxu0 %v2182_v11 }
 0x202   :  { %2008 = vmatprep.subr.bf16.mxu1 %v2183_v12  ;;  %2030 = vmatprep.subr.bf16.mxu0 %v2184_v13 }
 0x205   :  { %2009 = vmatpush3.bf16.msra.mxu1 %v2185_v14  ;;  %2031 = vmatpush3.bf16.msra.mxu0 %v2186_v15 }
 0x206   :  { %2010 = vmatprep.subr.bf16.mxu1 %v2187_v16  ;;  %2032 = vmatprep.subr.bf16.mxu0 %v2188_v17 }
 0x209   :  { %2011 = vmatpush3.bf16.msra.mxu1 %v2189_v18  ;;  %2033 = vmatpush3.bf16.msra.mxu0 %v2190_v19 }
 0x20a   :  { %2061 = vmatprep.subr.bf16.mxu1 %v2199_v33 }
 0x20c   :  { %1556 = vmatmul.mubr.bf16.vlgmr.msra.gmra.mrb[16].mxu1 %v918_v2  ;;  %1597 = vmatmul.mubr.bf16.vlgmr.msra.gmra.mrb[20].mxu0 %v920_v3  ;;  %v1894_v2 = vld [vmem:[%s2750_s8] ss:$0 sm:$0xff] }
 0x20d   :  { %2077 = vmatprep.mubr.msk.bf16.mxu1 %vm2200_vm0, %v2199_v33  ;;  %2062 = vmatpush3.bf16.msra.mxu1 %v2191_v20 }
 0x20e   :  { %2063 = vmatprep.subr.bf16.mxu1 %v2199_v33 }
 0x211   :  { %2064 = vmatpush3.bf16.msra.mxu1 %v2192_v21 }
 0x212   :  { %2065 = vmatprep.subr.bf16.mxu1 %v2199_v33 }
 0x215   :  { %2066 = vmatpush3.bf16.msra.mxu1 %v2193_v22 }
 0x216   :  { %2067 = vmatprep.subr.bf16.mxu1 %v2199_v33 }
 0x219   :  { %2068 = vmatpush3.bf16.msra.mxu1 %v2194_v23 }
 0x21a   :  { %2069 = vmatprep.subr.bf16.mxu1 %v2199_v33 }
 0x21d   :  { %2070 = vmatpush3.bf16.msra.mxu1 %v2195_v24 }
 0x21e   :  { %2071 = vmatprep.subr.bf16.mxu1 %v2199_v33 }
 0x221   :  { %2072 = vmatpush3.bf16.msra.mxu1 %v2196_v25 }
 0x222   :  { %2073 = vmatprep.subr.bf16.mxu1 %v2199_v33 }
 0x225   :  { %2074 = vmatpush3.bf16.msra.mxu1 %v2197_v26 }
 0x226   :  { %2075 = vmatprep.subr.bf16.mxu1 %v2199_v33 }
 0x229   :  { %2076 = vmatpush3.bf16.msra.mxu1 %v2198_v27 }
 0x2bf   :  { %v1968_v28 = vpop.f32.mrb[12].mxu1  ;;  %v1990_v29 = vpop.f32.mrb[16].mxu0 }
 0x2c0   :  { %v1969_v31 = vpop.f32.mrb[13].mxu1  ;;  %v1991_v32 = vpop.f32.mrb[17].mxu0 }
 0x2c1   :  { %v1970_v34 = vadd.f32 %v1969_v31, %v1968_v28  ;;  %v1992_v35 = vadd.f32 %v1991_v32, %v1990_v29  ;;  %v1971_v36 = vpop.f32.mrb[14].mxu1  ;;  %v1993_v37 = vpop.f32.mrb[18].mxu0 }
 0x2c2   :  { %v1972_v38 = vpop.f32.mrb[15].mxu1  ;;  %v1994_v39 = vpop.f32.mrb[19].mxu0 }
 0x2c3   :  { %v1476_v33 = vadd.f32 %v1970_v34, %v1829_v30  ;;  %v1973_v40 = vadd.f32 %v1972_v38, %v1971_v36  ;;  %v1995_v42 = vadd.f32 %v1994_v39, %v1993_v37 }
 0x2c5   :  { %v1517_v43 = vadd.f32 %v1992_v35, %v1476_v33  ;;  %v1479_v44 = vadd.f32 %v1973_v40, %v1829_v30 }
 0x2c7   :  { %v1520_v45 = vadd.f32 %v1995_v42, %v1479_v44 }
 0x2df   :  { %v2012_v46 = vpop.f32.mrb[16].mxu1  ;;  %v2034_v47 = vpop.f32.mrb[20].mxu0 }
 0x2e0   :  { %v2013_v48 = vpop.f32.mrb[17].mxu1  ;;  %v2035_v49 = vpop.f32.mrb[21].mxu0 }
 0x2e1   :  { %v2014_v50 = vadd.f32 %v2013_v48, %v2012_v46  ;;  %v2036_v51 = vadd.f32 %v2035_v49, %v2034_v47  ;;  %v2015_v52 = vpop.f32.mrb[18].mxu1  ;;  %v2037_v53 = vpop.f32.mrb[22].mxu0 }
 0x2e2   :  { %v2016_v54 = vpop.f32.mrb[19].mxu1  ;;  %v2038_v55 = vpop.f32.mrb[23].mxu0 }
 0x2e3   :  { %v1558_v56 = vadd.f32 %v2014_v50, %v1517_v43  ;;  %v2017_v57 = vadd.f32 %v2016_v54, %v2015_v52  ;;  %v2039_v58 = vadd.f32 %v2038_v55, %v2037_v53 }
 0x2e5   :  { %v1599_v59 = vadd.f32 %v2036_v51, %v1558_v56  ;;  %v1561_v60 = vadd.f32 %v2017_v57, %v1520_v45 }
 0x2e7   :  { %v1602_v61 = vadd.f32 %v2039_v58, %v1561_v60  ;;  %v1605_v62 = vmax.f32 %v1599_v59, 0.0 }
 0x2e9   :  { %v1606_v63 = vmax.f32 %v1602_v61, 0.0 }
 0x2eb   :  { %v1607_v0 = vpack.c.bf16 %v1606_v63, %v1605_v62 }
 0x2ed   :  { %2078 = vmatmul.mubr.bf16.vlgmr.msra.gmra.mrb[20].mxu1 %v1607_v0 }
 0x3c0   :  { %v1713_v3 = vpop.f32.mrb[20].mxu1 }
 0x3c1   :  { %v1714_v4 = vadd.f32 %v1894_v2, %v1713_v3  ;;  %v2079_v5 = vpop.f32.mrb[21].mxu1 }
 0x3c2   :  { %v1716_v6 = vpop.f32.mrb[22].mxu1 }
 0x3c3   :  { %v1717_v7 = vadd.f32 %v1894_v2, %v1716_v6  ;;  %v2080_v8 = vpop.f32.mrb[23].mxu1  ;;  %v1732_v9 = vsel %vm1731_vm2, %v1714_v4, 0.0  ;;  %v1723_v10 = vsel %vm1722_vm3, %v1714_v4, 0.0 }
 0x3c4   :  { %1734 = vadd.xlane.f32.xlu1 %v1732_v9  ;;  %1725 = vadd.xlane.f32.xlu0 %v1723_v10 }
 0x3c5   :  { %v1733_v11 = vsel %vm1731_vm2, %v1717_v7, 0.0  ;;  %v1724_v41 = vsel %vm1722_vm3, %v1717_v7, 0.0 }
 0x3c8   :  { %1736 = vadd.xlane.f32.xlu1 %v1733_v11  ;;  %1727 = vadd.xlane.f32.xlu0 %v1724_v41 }
 0x451   :  { %v1735_v12 = vpop.xlane.xlu1 %1734  ;;  %v1726_v13 = vpop.xlane.xlu0 %1725 }
 0x452   :  { %v1738_v14 = vadd.f32 %v1735_v12, %v1714_v4  ;;  %v1729_v15 = vmul.f32 0.16666667, %v1726_v13 }
 0x454   :  { %v1740_v16 = vsub.f32 %v1738_v14, %v1729_v15 }
 0x455   :  { %v1737_v17 = vpop.xlane.xlu1 %1736  ;;  %v1728_v18 = vpop.xlane.xlu0 %1727 }
 0x456   :  { %v1742_v19 = vsel %vm1722_vm3, %v1740_v16, 0.0  ;;  %v1739_v20 = vadd.f32 %v1737_v17, %v1717_v7  ;;  %v1730_v21 = vmul.f32 0.16666667, %v1728_v18 }
 0x457   :  { %1744 = vst [vmem:[%s2751_s9] sm:$0xff] %v1742_v19 }
 0x458   :  { %v1741_v22 = vsub.f32 %v1739_v20, %v1730_v21 }
 0x45a   :  { %v1743_v23 = vsel %vm1722_vm3, %v1741_v22, 0.0 }
 0x45b   :  { %1745 = vst [vmem:[%s2751_s9 + $0x8] sm:$0xff] %v1743_v23 }

</bundles_post_ra>
